<compile_context>
chip_gen: v5e
topology: v5e:2x2
jax: 0.10.0
libtpu: 0.0.40
codegen_flags: <defaults>
</compile_context>

<pallas_src>
import functools

import jax
import jax.numpy as jnp
from jax import lax
from jax.experimental import pallas as pl
from jax.experimental.pallas import tpu as pltpu

BN_EPS = 1e-5


def _pick_grid_steps(batch, max_bt=8):
    """Smallest grid length >= 2 (v7x has 2 TensorCores) whose per-step batch
    block Bt = batch // steps stays <= max_bt; falls back to 1 element/step."""
    for steps in range(2, batch + 1):
        if batch % steps == 0 and batch // steps <= max_bt:
            return steps
    return max(batch, 1)


# ----------------------------------------------------------------------------
# Pallas kernel: Bt batch elements per grid step (batch axis is "parallel").
# ----------------------------------------------------------------------------
def _residual_block_kernel(xc_ref, m_ref, w1_ref, b1_ref, w2_ref, b2_ref,
                           o_ref, *, Bt, W, N):
    # xc_ref : (Bt, C, N)   f32  concat([x, image, action_bcast]) channels
    # m_ref  : (9, C, Bt*N) f32  per-tap zero-pad validity masks (resident)
    # w1_ref : (9, C, C)    bf16 BN1-folded conv1 weights, tap-major
    # b1_ref : (C, 1)       f32  BN1-folded bias
    # w2_ref : (9, C, C)    bf16 BN2-folded conv2 weights
    # b2_ref : (C, 1)       f32  BN2-folded bias
    # o_ref  : (Bt, C, N)   f32  x_cat + block(x_cat)
    NL = Bt * N

    # Fold the Bt sub-batch elements onto the lane axis: (C, Bt*N).  Lane
    # concatenation of 256-lane pieces is tile-aligned (no sublane shuffles).
    if Bt == 1:
        x_cat = xc_ref[0]
    else:
        x_cat = jnp.concatenate([xc_ref[bi] for bi in range(Bt)], axis=1)

    # Relative tap offsets of a 3x3 SAME conv in row-major flat coordinates.
    offsets = [(ky - 1) * W + (kx - 1) for ky in range(3) for kx in range(3)]

    def conv3x3(inp, w_ref, b_ref):
        # inp: (C, NL) f32.  Nine accumulated (C, C) @ (C, NL) MXU matmuls with
        # bf16 operands and f32 accumulation.  Zero padding via the resident
        # masks; lane-roll wraps (across the image or across sub-batch slabs)
        # only ever land on masked-out taps.
        acc = None
        for t, off in enumerate(offsets):
            if off == 0:
                tap = inp                                     # center: no mask
            else:
                tap = pltpu.roll(inp, shift=(-off) % NL, axis=1) * m_ref[t]
            contrib = jnp.dot(w_ref[t], tap.astype(jnp.bfloat16),
                              preferred_element_type=jnp.float32)
            acc = contrib if acc is None else acc + contrib
        return acc + b_ref[...]

    h = jnp.maximum(conv3x3(x_cat, w1_ref, b1_ref), 0.0)      # conv1+BN1 -> ReLU
    y = conv3x3(h, w2_ref, b2_ref)                            # conv2+BN2
    out = x_cat + y                                           # residual add

    for bi in range(Bt):                                      # lane-dense stores
        o_ref[bi] = out[:, bi * N:(bi + 1) * N].astype(o_ref.dtype)


# ----------------------------------------------------------------------------
# Wrapper: concat + BN folding + mask precompute + pallas_call setup.
# ----------------------------------------------------------------------------
def residual_block_with_image(x, image, action, params, *, max_bt=8):
    B, Cx, H, W = x.shape
    Cimg = image.shape[1]
    A = action.shape[1]
    Cin = Cx + Cimg + A
    N = H * W

    w1, w2, bn1, bn2 = params          # w*: torch (Cout, Cin, 3, 3); bn*: (4, C)
    Cmid, Cout = w1.shape[0], w2.shape[0]
    assert w1.shape[1] == Cin, "conv1 input channels must equal concat channels"
    assert Cout == Cin and Cmid == Cout, (
        "residual add requires block output channels == concat channels")

    def fold_bn_taps(w, bn):
        # Inference-mode BN folded into the conv: y = conv(x, w*scale) + bias.
        gamma, beta, mean, var = bn[0], bn[1], bn[2], bn[3]
        scale = gamma * lax.rsqrt(var + BN_EPS)                      # (Cout,)
        wf = w * scale[:, None, None, None]                          # (Cout, Cin, 3, 3)
        # Tap-major (9, Cout, Cin): the kernel slices per-tap weights along the
        # leading (untiled) axis.
        w_taps = jnp.transpose(wf, (2, 3, 0, 1)).reshape(9, w.shape[0], w.shape[1])
        bias = (beta - mean * scale)[:, None]                        # (Cout, 1)
        return w_taps.astype(jnp.bfloat16), bias.astype(jnp.float32)

    w1t, b1 = fold_bn_taps(w1, bn1)
    w2t, b2 = fold_bn_taps(w2, bn2)

    # Channel concat done once here (one fused XLA copy) -> sublane-aligned
    # (Cin, N) blocks; removes all in-kernel misaligned sublane concats.
    xc = jnp.concatenate(
        [x.reshape(B, Cx, N),
         image.reshape(B, Cimg, N),
         jnp.broadcast_to(action[:, :, None], (B, A, N))],
        axis=1).astype(jnp.float32)                                  # (B, Cin, N)

    # Batch aggregation: Bt elements per grid step (folded onto lanes in the
    # kernel) while keeping >= 2 parallel steps for v7x's dual TensorCores.
    steps = _pick_grid_steps(B, max_bt)
    Bt = B // steps
    NL = Bt * N

    # Zero-padding validity masks for the 3x3 taps, computed ONCE, periodic in
    # N across the folded lane axis, pre-broadcast over channels (resident VMEM
    # block shared by both convs and all steps).  Index 4 (center) is unused.
    lane = jnp.arange(NL, dtype=jnp.int32)
    hh = (lane % N) // W
    ww = lane % W
    rows = []
    for ky in range(3):
        for kx in range(3):
            vy, vx = hh + (ky - 1), ww + (kx - 1)
            rows.append((vy >= 0) & (vy < H) & (vx >= 0) & (vx < W))
    masks = jnp.broadcast_to(
        jnp.stack(rows, axis=0).astype(jnp.float32)[:, None, :],
        (9, Cin, NL))

    kernel = functools.partial(_residual_block_kernel, Bt=Bt, W=W, N=N)

    grid_spec = pltpu.PrefetchScalarGridSpec(
        num_scalar_prefetch=0,
        grid=(steps,),
        in_specs=[
            pl.BlockSpec((Bt, Cin, N), lambda s: (s, 0, 0)),
            pl.BlockSpec((9, Cin, NL), lambda s: (0, 0, 0)),      # resident
            pl.BlockSpec((9, Cmid, Cin), lambda s: (0, 0, 0)),    # resident
            pl.BlockSpec((Cmid, 1), lambda s: (0, 0)),
            pl.BlockSpec((9, Cout, Cmid), lambda s: (0, 0, 0)),   # resident
            pl.BlockSpec((Cout, 1), lambda s: (0, 0)),
        ],
        out_specs=pl.BlockSpec((Bt, Cout, N), lambda s: (s, 0, 0)),
    )

    out_flat = pl.pallas_call(
        kernel,
        out_shape=jax.ShapeDtypeStruct((B, Cout, N), jnp.float32),
        grid_spec=grid_spec,
        compiler_params=pltpu.CompilerParams(
            dimension_semantics=("parallel",),
            vmem_limit_bytes=32 * 1024 * 1024),
    )(xc, masks, w1t, b1, w2t, b2)

    # (B, C, H*W) -> NCHW: contiguous reshape, free.
    return out_flat.reshape(B, Cout, H, W)


# ----------------------------------------------------------------------------
# Deterministic parameter init (matches nn.Conv2d / nn.BatchNorm2d shapes).
# ----------------------------------------------------------------------------
def init_params(key, cin, cmid, cout):
    k1, k2, k3, k4, k5, k6 = jax.random.split(key, 6)
    std1 = (2.0 / (9 * cin)) ** 0.5
    std2 = (2.0 / (9 * cmid)) ** 0.5
    # PyTorch conv weight layout (Cout, Cin, kH, kW).
    w1 = jax.random.normal(k1, (cmid, cin, 3, 3), jnp.float32) * std1
    w2 = jax.random.normal(k2, (cout, cmid, 3, 3), jnp.float32) * std2

    def bn_params(ka, kb, c):
        gamma = 1.0 + 0.1 * jax.random.normal(ka, (c,), jnp.float32)
        beta = 0.1 * jax.random.normal(kb, (c,), jnp.float32)
        mean = 0.05 * jnp.arange(c, dtype=jnp.float32)
        var = 1.0 + 0.02 * jnp.arange(c, dtype=jnp.float32)
        return jnp.stack([gamma, beta, mean, var], axis=0)   # (4, C)

    bn1 = bn_params(k3, k4, cmid)
    bn2 = bn_params(k5, k6, cout)
    return w1, w2, bn1, bn2


# ----------------------------------------------------------------------------
# Pure-JAX reference (unfolded BN, f32 lax.conv) for correctness check.
# ----------------------------------------------------------------------------
def reference(x, image, action, params):
    B, Cx, H, W = x.shape
    A = action.shape[1]
    w1, w2, bn1, bn2 = params
    x_f = jnp.transpose(x, (0, 2, 3, 1))
    img_f = jnp.transpose(image, (0, 2, 3, 1))
    act_f = jnp.broadcast_to(action[:, None, None, :], (B, H, W, A))
    xc = jnp.concatenate([x_f, img_f, act_f], axis=-1)

    def conv(z, w):  # w: torch (Cout, Cin, 3, 3) -> HWIO
        w_hwio = jnp.transpose(w, (2, 3, 1, 0))
        return lax.conv_general_dilated(
            z, w_hwio, (1, 1), "SAME",
            dimension_numbers=("NHWC", "HWIO", "NHWC"),
            precision=lax.Precision.HIGHEST)

    def bn(z, p):
        gamma, beta, mean, var = p[0], p[1], p[2], p[3]
        return (z - mean) * (gamma / jnp.sqrt(var + BN_EPS)) + beta

    h = jax.nn.relu(bn(conv(xc, w1), bn1))
    y = bn(conv(h, w2), bn2)
    out = xc + y
    return jnp.transpose(out, (0, 3, 1, 2))


if __name__ == "__main__":
    key = jax.random.PRNGKey(0)
    kx, ki, ka, kp = jax.random.split(key, 4)

    # B=4 -> grid of 2 "parallel" steps (v7x dual-TC friendly) with Bt=2 batch
    # elements folded onto the lane axis per step.
    B, Cx, Cimg, A, H, W = 4, 4, 3, 1, 16, 16
    Cin = Cx + Cimg + A          # in_features (state_features = 0)

    x = jax.random.normal(kx, (B, Cx, H, W), jnp.float32)
    image = jax.random.normal(ki, (B, Cimg, H, W), jnp.float32)
    action = jax.random.normal(ka, (B, A), jnp.float32)
    params = init_params(kp, Cin, Cin, Cin)

    out = jax.block_until_ready(residual_block_with_image(x, image, action, params))
    ref = jax.block_until_ready(reference(x, image, action, params))

    assert out.shape == (B, Cin, H, W), out.shape
    # bf16 MXU operands vs a true-f32 reference across two chained 3x3 convs:
    # differences are at the ~1e-2 level for O(1) activations.
    assert jnp.allclose(out, ref, atol=5e-2, rtol=1e-2), (
        float(jnp.max(jnp.abs(out - ref))))

    print("KERNEL_OK")
</pallas_src>

<mosaic_0001>
module attributes {stable_mosaic.version = 11 : i64} {
  func.func @_residual_block_kernel(%arg0: i32, %arg1: memref<2x8x256xf32, #tpu.memory_space<vmem>>, %arg2: memref<9x8x512xf32, #tpu.memory_space<vmem>>, %arg3: memref<9x8x8xbf16, #tpu.memory_space<vmem>>, %arg4: memref<8x1xf32, #tpu.memory_space<vmem>>, %arg5: memref<9x8x8xbf16, #tpu.memory_space<vmem>>, %arg6: memref<8x1xf32, #tpu.memory_space<vmem>>, %arg7: memref<2x8x256xf32, #tpu.memory_space<vmem>>) attributes {dimension_semantics = [#tpu.dimension_semantics<parallel>], iteration_bounds = array<i64: 2>, scalar_prefetch = 0 : i64, scratch_operands = 0 : i64, tpu.core_type = #tpu.core_type<tc>, window_params = [{transform_indices = @transform_0, window_bounds = array<i64: 2, 8, 256>}, {pipeline_mode = #tpu.pipeline_mode<synchronous>, transform_indices = @transform_1, window_bounds = array<i64: 9, 8, 512>}, {pipeline_mode = #tpu.pipeline_mode<synchronous>, transform_indices = @transform_2, window_bounds = array<i64: 9, 8, 8>}, {pipeline_mode = #tpu.pipeline_mode<synchronous>, transform_indices = @transform_3, window_bounds = array<i64: 8, 1>}, {pipeline_mode = #tpu.pipeline_mode<synchronous>, transform_indices = @transform_4, window_bounds = array<i64: 9, 8, 8>}, {pipeline_mode = #tpu.pipeline_mode<synchronous>, transform_indices = @transform_5, window_bounds = array<i64: 8, 1>}, {transform_indices = @transform_6, window_bounds = array<i64: 2, 8, 256>}]} {
    %c0 = arith.constant 0 : index
    %c0_0 = arith.constant 0 : index
    %c0_1 = arith.constant 0 : index
    %0 = vector.load %arg1[%c0, %c0_0, %c0_1] : memref<2x8x256xf32, #tpu.memory_space<vmem>>, vector<1x8x256xf32>
    %1 = vector.shape_cast %0 : vector<1x8x256xf32> to vector<8x256xf32>
    %c1 = arith.constant 1 : index
    %c0_2 = arith.constant 0 : index
    %c0_3 = arith.constant 0 : index
    %2 = vector.load %arg1[%c1, %c0_2, %c0_3] : memref<2x8x256xf32, #tpu.memory_space<vmem>>, vector<1x8x256xf32>
    %3 = vector.shape_cast %2 : vector<1x8x256xf32> to vector<8x256xf32>
    %4 = tpu.concatenate %1, %3 in 1 : vector<8x256xf32>, vector<8x256xf32> -> vector<8x512xf32>
    %c17_i32 = arith.constant 17 : i32
    %5 = tpu.dynamic_rotate %4 by %c17_i32 dim 1 : vector<8x512xf32>, i32 -> vector<8x512xf32>
    %c0_4 = arith.constant 0 : index
    %c0_5 = arith.constant 0 : index
    %c0_6 = arith.constant 0 : index
    %6 = vector.load %arg2[%c0_4, %c0_5, %c0_6] : memref<9x8x512xf32, #tpu.memory_space<vmem>>, vector<1x8x512xf32>
    %7 = vector.shape_cast %6 : vector<1x8x512xf32> to vector<8x512xf32>
    %8 = arith.mulf %5, %7 : vector<8x512xf32>
    %c0_7 = arith.constant 0 : index
    %c0_8 = arith.constant 0 : index
    %c0_9 = arith.constant 0 : index
    %9 = vector.load %arg3[%c0_7, %c0_8, %c0_9] : memref<9x8x8xbf16, #tpu.memory_space<vmem>>, vector<1x8x8xbf16>
    %10 = vector.shape_cast %9 : vector<1x8x8xbf16> to vector<8x8xbf16>
    %11 = arith.truncf %8 : vector<8x512xf32> to vector<8x512xbf16>
    %cst = arith.constant dense<0.000000e+00> : vector<8x512xf32>
    %12 = tpu.matmul %10, %11, %cst {dimension_numbers = #tpu.dot_dimension_numbers<[1], [0], [0], [1], [0, 0, 1, 1], [], []>} : vector<8x8xbf16>, vector<8x512xbf16>, vector<8x512xf32> -> vector<8x512xf32>
    %c16_i32 = arith.constant 16 : i32
    %13 = tpu.dynamic_rotate %4 by %c16_i32 dim 1 : vector<8x512xf32>, i32 -> vector<8x512xf32>
    %c1_10 = arith.constant 1 : index
    %c0_11 = arith.constant 0 : index
    %c0_12 = arith.constant 0 : index
    %14 = vector.load %arg2[%c1_10, %c0_11, %c0_12] : memref<9x8x512xf32, #tpu.memory_space<vmem>>, vector<1x8x512xf32>
    %15 = vector.shape_cast %14 : vector<1x8x512xf32> to vector<8x512xf32>
    %16 = arith.mulf %13, %15 : vector<8x512xf32>
    %c1_13 = arith.constant 1 : index
    %c0_14 = arith.constant 0 : index
    %c0_15 = arith.constant 0 : index
    %17 = vector.load %arg3[%c1_13, %c0_14, %c0_15] : memref<9x8x8xbf16, #tpu.memory_space<vmem>>, vector<1x8x8xbf16>
    %18 = vector.shape_cast %17 : vector<1x8x8xbf16> to vector<8x8xbf16>
    %19 = arith.truncf %16 : vector<8x512xf32> to vector<8x512xbf16>
    %cst_16 = arith.constant dense<0.000000e+00> : vector<8x512xf32>
    %20 = tpu.matmul %18, %19, %cst_16 {dimension_numbers = #tpu.dot_dimension_numbers<[1], [0], [0], [1], [0, 0, 1, 1], [], []>} : vector<8x8xbf16>, vector<8x512xbf16>, vector<8x512xf32> -> vector<8x512xf32>
    %21 = arith.addf %12, %20 : vector<8x512xf32>
    %c15_i32 = arith.constant 15 : i32
    %22 = tpu.dynamic_rotate %4 by %c15_i32 dim 1 : vector<8x512xf32>, i32 -> vector<8x512xf32>
    %c2 = arith.constant 2 : index
    %c0_17 = arith.constant 0 : index
    %c0_18 = arith.constant 0 : index
    %23 = vector.load %arg2[%c2, %c0_17, %c0_18] : memref<9x8x512xf32, #tpu.memory_space<vmem>>, vector<1x8x512xf32>
    %24 = vector.shape_cast %23 : vector<1x8x512xf32> to vector<8x512xf32>
    %25 = arith.mulf %22, %24 : vector<8x512xf32>
    %c2_19 = arith.constant 2 : index
    %c0_20 = arith.constant 0 : index
    %c0_21 = arith.constant 0 : index
    %26 = vector.load %arg3[%c2_19, %c0_20, %c0_21] : memref<9x8x8xbf16, #tpu.memory_space<vmem>>, vector<1x8x8xbf16>
    %27 = vector.shape_cast %26 : vector<1x8x8xbf16> to vector<8x8xbf16>
    %28 = arith.truncf %25 : vector<8x512xf32> to vector<8x512xbf16>
    %cst_22 = arith.constant dense<0.000000e+00> : vector<8x512xf32>
    %29 = tpu.matmul %27, %28, %cst_22 {dimension_numbers = #tpu.dot_dimension_numbers<[1], [0], [0], [1], [0, 0, 1, 1], [], []>} : vector<8x8xbf16>, vector<8x512xbf16>, vector<8x512xf32> -> vector<8x512xf32>
    %30 = arith.addf %21, %29 : vector<8x512xf32>
    %c1_i32 = arith.constant 1 : i32
    %31 = tpu.dynamic_rotate %4 by %c1_i32 dim 1 : vector<8x512xf32>, i32 -> vector<8x512xf32>
    %c3 = arith.constant 3 : index
    %c0_23 = arith.constant 0 : index
    %c0_24 = arith.constant 0 : index
    %32 = vector.load %arg2[%c3, %c0_23, %c0_24] : memref<9x8x512xf32, #tpu.memory_space<vmem>>, vector<1x8x512xf32>
    %33 = vector.shape_cast %32 : vector<1x8x512xf32> to vector<8x512xf32>
    %34 = arith.mulf %31, %33 : vector<8x512xf32>
    %c3_25 = arith.constant 3 : index
    %c0_26 = arith.constant 0 : index
    %c0_27 = arith.constant 0 : index
    %35 = vector.load %arg3[%c3_25, %c0_26, %c0_27] : memref<9x8x8xbf16, #tpu.memory_space<vmem>>, vector<1x8x8xbf16>
    %36 = vector.shape_cast %35 : vector<1x8x8xbf16> to vector<8x8xbf16>
    %37 = arith.truncf %34 : vector<8x512xf32> to vector<8x512xbf16>
    %cst_28 = arith.constant dense<0.000000e+00> : vector<8x512xf32>
    %38 = tpu.matmul %36, %37, %cst_28 {dimension_numbers = #tpu.dot_dimension_numbers<[1], [0], [0], [1], [0, 0, 1, 1], [], []>} : vector<8x8xbf16>, vector<8x512xbf16>, vector<8x512xf32> -> vector<8x512xf32>
    %39 = arith.addf %30, %38 : vector<8x512xf32>
    %c4 = arith.constant 4 : index
    %c0_29 = arith.constant 0 : index
    %c0_30 = arith.constant 0 : index
    %40 = vector.load %arg3[%c4, %c0_29, %c0_30] : memref<9x8x8xbf16, #tpu.memory_space<vmem>>, vector<1x8x8xbf16>
    %41 = vector.shape_cast %40 : vector<1x8x8xbf16> to vector<8x8xbf16>
    %42 = arith.truncf %4 : vector<8x512xf32> to vector<8x512xbf16>
    %cst_31 = arith.constant dense<0.000000e+00> : vector<8x512xf32>
    %43 = tpu.matmul %41, %42, %cst_31 {dimension_numbers = #tpu.dot_dimension_numbers<[1], [0], [0], [1], [0, 0, 1, 1], [], []>} : vector<8x8xbf16>, vector<8x512xbf16>, vector<8x512xf32> -> vector<8x512xf32>
    %44 = arith.addf %39, %43 : vector<8x512xf32>
    %c511_i32 = arith.constant 511 : i32
    %45 = tpu.dynamic_rotate %4 by %c511_i32 dim 1 : vector<8x512xf32>, i32 -> vector<8x512xf32>
    %c5 = arith.constant 5 : index
    %c0_32 = arith.constant 0 : index
    %c0_33 = arith.constant 0 : index
    %46 = vector.load %arg2[%c5, %c0_32, %c0_33] : memref<9x8x512xf32, #tpu.memory_space<vmem>>, vector<1x8x512xf32>
    %47 = vector.shape_cast %46 : vector<1x8x512xf32> to vector<8x512xf32>
    %48 = arith.mulf %45, %47 : vector<8x512xf32>
    %c5_34 = arith.constant 5 : index
    %c0_35 = arith.constant 0 : index
    %c0_36 = arith.constant 0 : index
    %49 = vector.load %arg3[%c5_34, %c0_35, %c0_36] : memref<9x8x8xbf16, #tpu.memory_space<vmem>>, vector<1x8x8xbf16>
    %50 = vector.shape_cast %49 : vector<1x8x8xbf16> to vector<8x8xbf16>
    %51 = arith.truncf %48 : vector<8x512xf32> to vector<8x512xbf16>
    %cst_37 = arith.constant dense<0.000000e+00> : vector<8x512xf32>
    %52 = tpu.matmul %50, %51, %cst_37 {dimension_numbers = #tpu.dot_dimension_numbers<[1], [0], [0], [1], [0, 0, 1, 1], [], []>} : vector<8x8xbf16>, vector<8x512xbf16>, vector<8x512xf32> -> vector<8x512xf32>
    %53 = arith.addf %44, %52 : vector<8x512xf32>
    %c497_i32 = arith.constant 497 : i32
    %54 = tpu.dynamic_rotate %4 by %c497_i32 dim 1 : vector<8x512xf32>, i32 -> vector<8x512xf32>
    %c6 = arith.constant 6 : index
    %c0_38 = arith.constant 0 : index
    %c0_39 = arith.constant 0 : index
    %55 = vector.load %arg2[%c6, %c0_38, %c0_39] : memref<9x8x512xf32, #tpu.memory_space<vmem>>, vector<1x8x512xf32>
    %56 = vector.shape_cast %55 : vector<1x8x512xf32> to vector<8x512xf32>
    %57 = arith.mulf %54, %56 : vector<8x512xf32>
    %c6_40 = arith.constant 6 : index
    %c0_41 = arith.constant 0 : index
    %c0_42 = arith.constant 0 : index
    %58 = vector.load %arg3[%c6_40, %c0_41, %c0_42] : memref<9x8x8xbf16, #tpu.memory_space<vmem>>, vector<1x8x8xbf16>
    %59 = vector.shape_cast %58 : vector<1x8x8xbf16> to vector<8x8xbf16>
    %60 = arith.truncf %57 : vector<8x512xf32> to vector<8x512xbf16>
    %cst_43 = arith.constant dense<0.000000e+00> : vector<8x512xf32>
    %61 = tpu.matmul %59, %60, %cst_43 {dimension_numbers = #tpu.dot_dimension_numbers<[1], [0], [0], [1], [0, 0, 1, 1], [], []>} : vector<8x8xbf16>, vector<8x512xbf16>, vector<8x512xf32> -> vector<8x512xf32>
    %62 = arith.addf %53, %61 : vector<8x512xf32>
    %c496_i32 = arith.constant 496 : i32
    %63 = tpu.dynamic_rotate %4 by %c496_i32 dim 1 : vector<8x512xf32>, i32 -> vector<8x512xf32>
    %c7 = arith.constant 7 : index
    %c0_44 = arith.constant 0 : index
    %c0_45 = arith.constant 0 : index
    %64 = vector.load %arg2[%c7, %c0_44, %c0_45] : memref<9x8x512xf32, #tpu.memory_space<vmem>>, vector<1x8x512xf32>
    %65 = vector.shape_cast %64 : vector<1x8x512xf32> to vector<8x512xf32>
    %66 = arith.mulf %63, %65 : vector<8x512xf32>
    %c7_46 = arith.constant 7 : index
    %c0_47 = arith.constant 0 : index
    %c0_48 = arith.constant 0 : index
    %67 = vector.load %arg3[%c7_46, %c0_47, %c0_48] : memref<9x8x8xbf16, #tpu.memory_space<vmem>>, vector<1x8x8xbf16>
    %68 = vector.shape_cast %67 : vector<1x8x8xbf16> to vector<8x8xbf16>
    %69 = arith.truncf %66 : vector<8x512xf32> to vector<8x512xbf16>
    %cst_49 = arith.constant dense<0.000000e+00> : vector<8x512xf32>
    %70 = tpu.matmul %68, %69, %cst_49 {dimension_numbers = #tpu.dot_dimension_numbers<[1], [0], [0], [1], [0, 0, 1, 1], [], []>} : vector<8x8xbf16>, vector<8x512xbf16>, vector<8x512xf32> -> vector<8x512xf32>
    %71 = arith.addf %62, %70 : vector<8x512xf32>
    %c495_i32 = arith.constant 495 : i32
    %72 = tpu.dynamic_rotate %4 by %c495_i32 dim 1 : vector<8x512xf32>, i32 -> vector<8x512xf32>
    %c8 = arith.constant 8 : index
    %c0_50 = arith.constant 0 : index
    %c0_51 = arith.constant 0 : index
    %73 = vector.load %arg2[%c8, %c0_50, %c0_51] : memref<9x8x512xf32, #tpu.memory_space<vmem>>, vector<1x8x512xf32>
    %74 = vector.shape_cast %73 : vector<1x8x512xf32> to vector<8x512xf32>
    %75 = arith.mulf %72, %74 : vector<8x512xf32>
    %c8_52 = arith.constant 8 : index
    %c0_53 = arith.constant 0 : index
    %c0_54 = arith.constant 0 : index
    %76 = vector.load %arg3[%c8_52, %c0_53, %c0_54] : memref<9x8x8xbf16, #tpu.memory_space<vmem>>, vector<1x8x8xbf16>
    %77 = vector.shape_cast %76 : vector<1x8x8xbf16> to vector<8x8xbf16>
    %78 = arith.truncf %75 : vector<8x512xf32> to vector<8x512xbf16>
    %cst_55 = arith.constant dense<0.000000e+00> : vector<8x512xf32>
    %79 = tpu.matmul %77, %78, %cst_55 {dimension_numbers = #tpu.dot_dimension_numbers<[1], [0], [0], [1], [0, 0, 1, 1], [], []>} : vector<8x8xbf16>, vector<8x512xbf16>, vector<8x512xf32> -> vector<8x512xf32>
    %80 = arith.addf %71, %79 : vector<8x512xf32>
    %c0_56 = arith.constant 0 : index
    %c0_57 = arith.constant 0 : index
    %81 = vector.load %arg4[%c0_56, %c0_57] : memref<8x1xf32, #tpu.memory_space<vmem>>, vector<8x1xf32>
    %82 = vector.broadcast %81 : vector<8x1xf32> to vector<8x512xf32>
    %83 = arith.addf %80, %82 : vector<8x512xf32>
    %cst_58 = arith.constant 0.000000e+00 : f32
    %84 = vector.broadcast %cst_58 : f32 to vector<8x512xf32>
    %85 = arith.maximumf %83, %84 : vector<8x512xf32>
    %c17_i32_59 = arith.constant 17 : i32
    %86 = tpu.dynamic_rotate %85 by %c17_i32_59 dim 1 : vector<8x512xf32>, i32 -> vector<8x512xf32>
    %c0_60 = arith.constant 0 : index
    %c0_61 = arith.constant 0 : index
    %c0_62 = arith.constant 0 : index
    %87 = vector.load %arg2[%c0_60, %c0_61, %c0_62] : memref<9x8x512xf32, #tpu.memory_space<vmem>>, vector<1x8x512xf32>
    %88 = vector.shape_cast %87 : vector<1x8x512xf32> to vector<8x512xf32>
    %89 = arith.mulf %86, %88 : vector<8x512xf32>
    %c0_63 = arith.constant 0 : index
    %c0_64 = arith.constant 0 : index
    %c0_65 = arith.constant 0 : index
    %90 = vector.load %arg5[%c0_63, %c0_64, %c0_65] : memref<9x8x8xbf16, #tpu.memory_space<vmem>>, vector<1x8x8xbf16>
    %91 = vector.shape_cast %90 : vector<1x8x8xbf16> to vector<8x8xbf16>
    %92 = arith.truncf %89 : vector<8x512xf32> to vector<8x512xbf16>
    %cst_66 = arith.constant dense<0.000000e+00> : vector<8x512xf32>
    %93 = tpu.matmul %91, %92, %cst_66 {dimension_numbers = #tpu.dot_dimension_numbers<[1], [0], [0], [1], [0, 0, 1, 1], [], []>} : vector<8x8xbf16>, vector<8x512xbf16>, vector<8x512xf32> -> vector<8x512xf32>
    %c16_i32_67 = arith.constant 16 : i32
    %94 = tpu.dynamic_rotate %85 by %c16_i32_67 dim 1 : vector<8x512xf32>, i32 -> vector<8x512xf32>
    %c1_68 = arith.constant 1 : index
    %c0_69 = arith.constant 0 : index
    %c0_70 = arith.constant 0 : index
    %95 = vector.load %arg2[%c1_68, %c0_69, %c0_70] : memref<9x8x512xf32, #tpu.memory_space<vmem>>, vector<1x8x512xf32>
    %96 = vector.shape_cast %95 : vector<1x8x512xf32> to vector<8x512xf32>
    %97 = arith.mulf %94, %96 : vector<8x512xf32>
    %c1_71 = arith.constant 1 : index
    %c0_72 = arith.constant 0 : index
    %c0_73 = arith.constant 0 : index
    %98 = vector.load %arg5[%c1_71, %c0_72, %c0_73] : memref<9x8x8xbf16, #tpu.memory_space<vmem>>, vector<1x8x8xbf16>
    %99 = vector.shape_cast %98 : vector<1x8x8xbf16> to vector<8x8xbf16>
    %100 = arith.truncf %97 : vector<8x512xf32> to vector<8x512xbf16>
    %cst_74 = arith.constant dense<0.000000e+00> : vector<8x512xf32>
    %101 = tpu.matmul %99, %100, %cst_74 {dimension_numbers = #tpu.dot_dimension_numbers<[1], [0], [0], [1], [0, 0, 1, 1], [], []>} : vector<8x8xbf16>, vector<8x512xbf16>, vector<8x512xf32> -> vector<8x512xf32>
    %102 = arith.addf %93, %101 : vector<8x512xf32>
    %c15_i32_75 = arith.constant 15 : i32
    %103 = tpu.dynamic_rotate %85 by %c15_i32_75 dim 1 : vector<8x512xf32>, i32 -> vector<8x512xf32>
    %c2_76 = arith.constant 2 : index
    %c0_77 = arith.constant 0 : index
    %c0_78 = arith.constant 0 : index
    %104 = vector.load %arg2[%c2_76, %c0_77, %c0_78] : memref<9x8x512xf32, #tpu.memory_space<vmem>>, vector<1x8x512xf32>
    %105 = vector.shape_cast %104 : vector<1x8x512xf32> to vector<8x512xf32>
    %106 = arith.mulf %103, %105 : vector<8x512xf32>
    %c2_79 = arith.constant 2 : index
    %c0_80 = arith.constant 0 : index
    %c0_81 = arith.constant 0 : index
    %107 = vector.load %arg5[%c2_79, %c0_80, %c0_81] : memref<9x8x8xbf16, #tpu.memory_space<vmem>>, vector<1x8x8xbf16>
    %108 = vector.shape_cast %107 : vector<1x8x8xbf16> to vector<8x8xbf16>
    %109 = arith.truncf %106 : vector<8x512xf32> to vector<8x512xbf16>
    %cst_82 = arith.constant dense<0.000000e+00> : vector<8x512xf32>
    %110 = tpu.matmul %108, %109, %cst_82 {dimension_numbers = #tpu.dot_dimension_numbers<[1], [0], [0], [1], [0, 0, 1, 1], [], []>} : vector<8x8xbf16>, vector<8x512xbf16>, vector<8x512xf32> -> vector<8x512xf32>
    %111 = arith.addf %102, %110 : vector<8x512xf32>
    %c1_i32_83 = arith.constant 1 : i32
    %112 = tpu.dynamic_rotate %85 by %c1_i32_83 dim 1 : vector<8x512xf32>, i32 -> vector<8x512xf32>
    %c3_84 = arith.constant 3 : index
    %c0_85 = arith.constant 0 : index
    %c0_86 = arith.constant 0 : index
    %113 = vector.load %arg2[%c3_84, %c0_85, %c0_86] : memref<9x8x512xf32, #tpu.memory_space<vmem>>, vector<1x8x512xf32>
    %114 = vector.shape_cast %113 : vector<1x8x512xf32> to vector<8x512xf32>
    %115 = arith.mulf %112, %114 : vector<8x512xf32>
    %c3_87 = arith.constant 3 : index
    %c0_88 = arith.constant 0 : index
    %c0_89 = arith.constant 0 : index
    %116 = vector.load %arg5[%c3_87, %c0_88, %c0_89] : memref<9x8x8xbf16, #tpu.memory_space<vmem>>, vector<1x8x8xbf16>
    %117 = vector.shape_cast %116 : vector<1x8x8xbf16> to vector<8x8xbf16>
    %118 = arith.truncf %115 : vector<8x512xf32> to vector<8x512xbf16>
    %cst_90 = arith.constant dense<0.000000e+00> : vector<8x512xf32>
    %119 = tpu.matmul %117, %118, %cst_90 {dimension_numbers = #tpu.dot_dimension_numbers<[1], [0], [0], [1], [0, 0, 1, 1], [], []>} : vector<8x8xbf16>, vector<8x512xbf16>, vector<8x512xf32> -> vector<8x512xf32>
    %120 = arith.addf %111, %119 : vector<8x512xf32>
    %c4_91 = arith.constant 4 : index
    %c0_92 = arith.constant 0 : index
    %c0_93 = arith.constant 0 : index
    %121 = vector.load %arg5[%c4_91, %c0_92, %c0_93] : memref<9x8x8xbf16, #tpu.memory_space<vmem>>, vector<1x8x8xbf16>
    %122 = vector.shape_cast %121 : vector<1x8x8xbf16> to vector<8x8xbf16>
    %123 = arith.truncf %85 : vector<8x512xf32> to vector<8x512xbf16>
    %cst_94 = arith.constant dense<0.000000e+00> : vector<8x512xf32>
    %124 = tpu.matmul %122, %123, %cst_94 {dimension_numbers = #tpu.dot_dimension_numbers<[1], [0], [0], [1], [0, 0, 1, 1], [], []>} : vector<8x8xbf16>, vector<8x512xbf16>, vector<8x512xf32> -> vector<8x512xf32>
    %125 = arith.addf %120, %124 : vector<8x512xf32>
    %c511_i32_95 = arith.constant 511 : i32
    %126 = tpu.dynamic_rotate %85 by %c511_i32_95 dim 1 : vector<8x512xf32>, i32 -> vector<8x512xf32>
    %c5_96 = arith.constant 5 : index
    %c0_97 = arith.constant 0 : index
    %c0_98 = arith.constant 0 : index
    %127 = vector.load %arg2[%c5_96, %c0_97, %c0_98] : memref<9x8x512xf32, #tpu.memory_space<vmem>>, vector<1x8x512xf32>
    %128 = vector.shape_cast %127 : vector<1x8x512xf32> to vector<8x512xf32>
    %129 = arith.mulf %126, %128 : vector<8x512xf32>
    %c5_99 = arith.constant 5 : index
    %c0_100 = arith.constant 0 : index
    %c0_101 = arith.constant 0 : index
    %130 = vector.load %arg5[%c5_99, %c0_100, %c0_101] : memref<9x8x8xbf16, #tpu.memory_space<vmem>>, vector<1x8x8xbf16>
    %131 = vector.shape_cast %130 : vector<1x8x8xbf16> to vector<8x8xbf16>
    %132 = arith.truncf %129 : vector<8x512xf32> to vector<8x512xbf16>
    %cst_102 = arith.constant dense<0.000000e+00> : vector<8x512xf32>
    %133 = tpu.matmul %131, %132, %cst_102 {dimension_numbers = #tpu.dot_dimension_numbers<[1], [0], [0], [1], [0, 0, 1, 1], [], []>} : vector<8x8xbf16>, vector<8x512xbf16>, vector<8x512xf32> -> vector<8x512xf32>
    %134 = arith.addf %125, %133 : vector<8x512xf32>
    %c497_i32_103 = arith.constant 497 : i32
    %135 = tpu.dynamic_rotate %85 by %c497_i32_103 dim 1 : vector<8x512xf32>, i32 -> vector<8x512xf32>
    %c6_104 = arith.constant 6 : index
    %c0_105 = arith.constant 0 : index
    %c0_106 = arith.constant 0 : index
    %136 = vector.load %arg2[%c6_104, %c0_105, %c0_106] : memref<9x8x512xf32, #tpu.memory_space<vmem>>, vector<1x8x512xf32>
    %137 = vector.shape_cast %136 : vector<1x8x512xf32> to vector<8x512xf32>
    %138 = arith.mulf %135, %137 : vector<8x512xf32>
    %c6_107 = arith.constant 6 : index
    %c0_108 = arith.constant 0 : index
    %c0_109 = arith.constant 0 : index
    %139 = vector.load %arg5[%c6_107, %c0_108, %c0_109] : memref<9x8x8xbf16, #tpu.memory_space<vmem>>, vector<1x8x8xbf16>
    %140 = vector.shape_cast %139 : vector<1x8x8xbf16> to vector<8x8xbf16>
    %141 = arith.truncf %138 : vector<8x512xf32> to vector<8x512xbf16>
    %cst_110 = arith.constant dense<0.000000e+00> : vector<8x512xf32>
    %142 = tpu.matmul %140, %141, %cst_110 {dimension_numbers = #tpu.dot_dimension_numbers<[1], [0], [0], [1], [0, 0, 1, 1], [], []>} : vector<8x8xbf16>, vector<8x512xbf16>, vector<8x512xf32> -> vector<8x512xf32>
    %143 = arith.addf %134, %142 : vector<8x512xf32>
    %c496_i32_111 = arith.constant 496 : i32
    %144 = tpu.dynamic_rotate %85 by %c496_i32_111 dim 1 : vector<8x512xf32>, i32 -> vector<8x512xf32>
    %c7_112 = arith.constant 7 : index
    %c0_113 = arith.constant 0 : index
    %c0_114 = arith.constant 0 : index
    %145 = vector.load %arg2[%c7_112, %c0_113, %c0_114] : memref<9x8x512xf32, #tpu.memory_space<vmem>>, vector<1x8x512xf32>
    %146 = vector.shape_cast %145 : vector<1x8x512xf32> to vector<8x512xf32>
    %147 = arith.mulf %144, %146 : vector<8x512xf32>
    %c7_115 = arith.constant 7 : index
    %c0_116 = arith.constant 0 : index
    %c0_117 = arith.constant 0 : index
    %148 = vector.load %arg5[%c7_115, %c0_116, %c0_117] : memref<9x8x8xbf16, #tpu.memory_space<vmem>>, vector<1x8x8xbf16>
    %149 = vector.shape_cast %148 : vector<1x8x8xbf16> to vector<8x8xbf16>
    %150 = arith.truncf %147 : vector<8x512xf32> to vector<8x512xbf16>
    %cst_118 = arith.constant dense<0.000000e+00> : vector<8x512xf32>
    %151 = tpu.matmul %149, %150, %cst_118 {dimension_numbers = #tpu.dot_dimension_numbers<[1], [0], [0], [1], [0, 0, 1, 1], [], []>} : vector<8x8xbf16>, vector<8x512xbf16>, vector<8x512xf32> -> vector<8x512xf32>
    %152 = arith.addf %143, %151 : vector<8x512xf32>
    %c495_i32_119 = arith.constant 495 : i32
    %153 = tpu.dynamic_rotate %85 by %c495_i32_119 dim 1 : vector<8x512xf32>, i32 -> vector<8x512xf32>
    %c8_120 = arith.constant 8 : index
    %c0_121 = arith.constant 0 : index
    %c0_122 = arith.constant 0 : index
    %154 = vector.load %arg2[%c8_120, %c0_121, %c0_122] : memref<9x8x512xf32, #tpu.memory_space<vmem>>, vector<1x8x512xf32>
    %155 = vector.shape_cast %154 : vector<1x8x512xf32> to vector<8x512xf32>
    %156 = arith.mulf %153, %155 : vector<8x512xf32>
    %c8_123 = arith.constant 8 : index
    %c0_124 = arith.constant 0 : index
    %c0_125 = arith.constant 0 : index
    %157 = vector.load %arg5[%c8_123, %c0_124, %c0_125] : memref<9x8x8xbf16, #tpu.memory_space<vmem>>, vector<1x8x8xbf16>
    %158 = vector.shape_cast %157 : vector<1x8x8xbf16> to vector<8x8xbf16>
    %159 = arith.truncf %156 : vector<8x512xf32> to vector<8x512xbf16>
    %cst_126 = arith.constant dense<0.000000e+00> : vector<8x512xf32>
    %160 = tpu.matmul %158, %159, %cst_126 {dimension_numbers = #tpu.dot_dimension_numbers<[1], [0], [0], [1], [0, 0, 1, 1], [], []>} : vector<8x8xbf16>, vector<8x512xbf16>, vector<8x512xf32> -> vector<8x512xf32>
    %161 = arith.addf %152, %160 : vector<8x512xf32>
    %c0_127 = arith.constant 0 : index
    %c0_128 = arith.constant 0 : index
    %162 = vector.load %arg6[%c0_127, %c0_128] : memref<8x1xf32, #tpu.memory_space<vmem>>, vector<8x1xf32>
    %163 = vector.broadcast %162 : vector<8x1xf32> to vector<8x512xf32>
    %164 = arith.addf %161, %163 : vector<8x512xf32>
    %165 = arith.addf %4, %164 : vector<8x512xf32>
    %166 = vector.extract_strided_slice %165 {offsets = [0, 0], sizes = [8, 256], strides = [1, 1]} : vector<8x512xf32> to vector<8x256xf32>
    %c0_129 = arith.constant 0 : index
    %c0_130 = arith.constant 0 : index
    %c0_131 = arith.constant 0 : index
    %167 = vector.load %arg7[%c0_129, %c0_130, %c0_131] : memref<2x8x256xf32, #tpu.memory_space<vmem>>, vector<1x8x256xf32>
    %168 = vector.shape_cast %167 : vector<1x8x256xf32> to vector<8x256xf32>
    %169 = vector.shape_cast %166 : vector<8x256xf32> to vector<1x8x256xf32>
    tpu.vector_store %arg7[%c0_129, %c0_130, %c0_131], %169 {strides = array<i32>} : memref<2x8x256xf32, #tpu.memory_space<vmem>>, vector<1x8x256xf32>,
    %170 = vector.extract_strided_slice %165 {offsets = [0, 256], sizes = [8, 256], strides = [1, 1]} : vector<8x512xf32> to vector<8x256xf32>
    %c1_132 = arith.constant 1 : index
    %c0_133 = arith.constant 0 : index
    %c0_134 = arith.constant 0 : index
    %171 = vector.load %arg7[%c1_132, %c0_133, %c0_134] : memref<2x8x256xf32, #tpu.memory_space<vmem>>, vector<1x8x256xf32>
    %172 = vector.shape_cast %171 : vector<1x8x256xf32> to vector<8x256xf32>
    %173 = vector.shape_cast %170 : vector<8x256xf32> to vector<1x8x256xf32>
    tpu.vector_store %arg7[%c1_132, %c0_133, %c0_134], %173 {strides = array<i32>} : memref<2x8x256xf32, #tpu.memory_space<vmem>>, vector<1x8x256xf32>,
    return
  }
  func.func @transform_0(%arg0: i32) -> (i32, i32, i32) {
    %c0_i32 = arith.constant 0 : i32
    %c0_i32_0 = arith.constant 0 : i32
    %c0_i32_1 = arith.constant 0 : i32
    return %arg0, %c0_i32, %c0_i32_0 : i32, i32, i32
  }
  func.func @transform_1(%arg0: i32) -> (i32, i32, i32) {
    %c0_i32 = arith.constant 0 : i32
    %c0_i32_0 = arith.constant 0 : i32
    %c0_i32_1 = arith.constant 0 : i32
    %c0_i32_2 = arith.constant 0 : i32
    return %c0_i32, %c0_i32_0, %c0_i32_1 : i32, i32, i32
  }
  func.func @transform_2(%arg0: i32) -> (i32, i32, i32) {
    %c0_i32 = arith.constant 0 : i32
    %c0_i32_0 = arith.constant 0 : i32
    %c0_i32_1 = arith.constant 0 : i32
    %c0_i32_2 = arith.constant 0 : i32
    return %c0_i32, %c0_i32_0, %c0_i32_1 : i32, i32, i32
  }
  func.func @transform_3(%arg0: i32) -> (i32, i32) {
    %c0_i32 = arith.constant 0 : i32
    %c0_i32_0 = arith.constant 0 : i32
    %c0_i32_1 = arith.constant 0 : i32
    return %c0_i32, %c0_i32_0 : i32, i32
  }
  func.func @transform_4(%arg0: i32) -> (i32, i32, i32) {
    %c0_i32 = arith.constant 0 : i32
    %c0_i32_0 = arith.constant 0 : i32
    %c0_i32_1 = arith.constant 0 : i32
    %c0_i32_2 = arith.constant 0 : i32
    return %c0_i32, %c0_i32_0, %c0_i32_1 : i32, i32, i32
  }
  func.func @transform_5(%arg0: i32) -> (i32, i32) {
    %c0_i32 = arith.constant 0 : i32
    %c0_i32_0 = arith.constant 0 : i32
    %c0_i32_1 = arith.constant 0 : i32
    return %c0_i32, %c0_i32_0 : i32, i32
  }
  func.func @transform_6(%arg0: i32) -> (i32, i32, i32) {
    %c0_i32 = arith.constant 0 : i32
    %c0_i32_0 = arith.constant 0 : i32
    %c0_i32_1 = arith.constant 0 : i32
    return %arg0, %c0_i32, %c0_i32_0 : i32, i32, i32
  }
}

</mosaic_0001>

<bundles_post_ra>
// kernel: tpu_custom_call.1
= control target key start
LH: loop header
LB: loop body
LE: loop exit
PB: predicated region body
PF: predicated region fallthrough
CT: control target
= control target key end

     0   :  { %11 = vsyncpa [#allocation3], 0  ;;  %s3150_s0 = inlined_call_operand.vmem [shape: f32[4,8,256], index: 0, kind: input, shape index: {}]   ;;  %s3151_s1 = inlined_call_operand.hbm [shape: f32[9,8,512], index: 1, kind: input, shape index: {}]   ;;  %s3152_s2 = inlined_call_operand.vmem [shape: bf16[9,8,8], index: 2, kind: input, shape index: {}]   ;;  %s3153_s3 = inlined_call_operand.vmem [shape: f32[8,1], index: 3, kind: input, shape index: {}]   ;;  %s3154_s4 = inlined_call_operand.vmem [shape: bf16[9,8,8], index: 4, kind: input, shape index: {}]   ;;  %s3155_s5 = inlined_call_operand.vmem [shape: f32[8,1], index: 5, kind: input, shape index: {}]   ;;  %s3156_s6 = inlined_call_operand.hbm [shape: f32[4,8,256], index: 6, kind: output, shape index: {}]  }
   0x1   :  { %12 = vsyncpa [#allocation4], 0 }
   0x2   :  { %14 = vsyncpa [#allocation4 + $0x1], 0  ;;  %s2403_s21 = smov 0   ;;  %s2405_s22 = smov 0  }
   0x3   :  { %s2407_s23 = smov 0   ;;  %s2409_s24 = smov 0  }
   0x4 LB: > { %s2424_s25 = sadd.s32 4294967295, %s2353_s24   ;;  %s2078_s26 = sadd.s32 4294967294, %s2353_s24   ;;  %s2353_s24 = sphi %s2409_s24, %s3186_s24   ;;  %s2349_s23 = sphi %s2407_s23, %s3185_s23   ;;  %s2345_s22 = sphi %s2405_s22, %s3184_s22   ;;  %s2341_s21 = sphi %s2403_s21, %s3183_s21  }
   0x5   : > { %s2428_s27 = sadd.s32 1, %s2353_s24   ;;  %s158_s28 = sadd.s32 1, %s2349_s23 }
   0x6   : > { %s155_s29 = ssub.s32 %s2353_s24, %s2428_s27  ;;  %p168_p0 = scmp.ne.s32.totalorder %s2349_s23, %s2345_s22 }
   0x7   : > { %p156_p1 = scmp.eq.s32.totalorder %s155_s29, 0  ;;  %p169_p2 = scmp.eq.s32.totalorder %s2424_s25, 1 }
   0x8   : > { %p174_p3 = scmp.ne.s32.totalorder %s2345_s22, %s2341_s21  ;;  %p175_p4 = scmp.eq.s32.totalorder %s2078_s26, 1 }
   0x9   : > { %s2439_s30 = scalar_select %p156_p1, %s2349_s23, %s158_s28  }
   0xa   : > { %p2441_p5 = por %p169_p2, %p168_p0  ;;  %p2445_p6 = por %p175_p4, %p174_p3 }
   0xb   : > { %p2079_p7 = scmp.ge.s32.totalorder %s2353_s24, 1  ;;  %p182_p8 = scmp.lt.s32.totalorder %s2353_s24, 3 }
   0xc   : > { %p2203_p9 = scmp.eq.s32.totalorder %s2424_s25, 0  ;;  %s193_s11 = sshll.u32 %s3151_s1, 4  ;;  %s194_s11 = int_to_ptr.hbm [resolvable:$true] %s193_s11 }
   0xd   : > { %p183_p10 = pnand %p2079_p7, %p182_p8  ;;  %s2355_s12 = smov [#allocation2]  }
   0xe   : > { %s195_s13 = sshll.u32 %s2355_s12, 4  ;;  %s2356_s14 = smov 512   ;;  %s196_s13 = int_to_ptr.vmem [resolvable:$true] %s195_s13 }
   0xf   : > { %p2195_p11 = pneg %p183_p10  ;;  %s2357_s15 = smov 32  }
  0x10   : > { %233 = sbr.rel (%p183_p10) target bundleno = 823 (0x337), region = 44 }
  0x11   : > { %p2196_p12 = pnand %p2203_p9, %p2195_p11 }
  0x13   : > { %2198 = dma.hbm_to_vmem [thread:$0]  (!%p2196_p12), %s194_s11, 4608, %s196_s13, [#allocation3], %s2356_s14, %s2356_s14, %s2357_s15  }
  0x15   : > { %2332 = dma.done.wait (%p2203_p9), [#allocation3], 4608  }
  0x16   : > { %2334 = vsyncadd (%p2203_p9), [#allocation3], 4294962688  ;;  %s2085_s16 = sshll.u32 %s2424_s25, 1  ;;  %s2358_s26 = smov 16   ;;  %v287_v6 = vlaneseq  ;;  %v2548_v11 = vld [vmem:[#allocation2 + $0x10] sm:$0xff]  ;;  %v2557_v15 = vld [vmem:[#allocation2 + $0x20] sm:$0xff] }
  0x17   : > { %p266_p13 = scmp.lt.s32.totalorder %s2085_s16, 3  ;;  %s2359_s28 = smov 17   ;;  %v2559_v16 = vld [vmem:[#allocation2 + $0x28] sm:$0xff]  ;;  %v2561_v17 = vld [vmem:[#allocation2 + $0x30] sm:$0xff]  ;;  %v2563_v18 = vld [vmem:[#allocation2 + $0x38] sm:$0xff]  ;;  %vm339_vm3 = vcmask 1043456  }
  0x18   : > { %s2360_s29 = smov 15   ;;  %s2361_s9 = smov 1   ;;  %v2545_v8 = vand.u32 127, %v287_v6  ;;  %v2581_v31 = vld [vmem:[#allocation2 + $0x48] sm:$0xff]  ;;  %v2090_v43 = vld [vmem:[%s3152_s2 + $0x4] sm:$0xf] }
  0x19   : > { %s3188_s16 = smov (!%p266_p13, %s2085_s16), 3  ;;  %s2362_s10 = smov 127   ;;  %v2589_v42 = vld [vmem:[#allocation2 + $0x8] sm:$0xff]  ;;  %vm335_vm4 = vcmask 64512   ;;  %v2594_v44 = vld [vmem:[#allocation2] sm:$0xff]  ;;  %v2596_v45 = vld [vmem:[#allocation2 + $0x18] sm:$0xff] }
  0x1a   : > { %s2186_s17 = sshll.u32 %s3188_s16, 4  ;;  %s2363_s11 = smov 113   ;;  %vm289_vm0 = vcmp.lt.s32.totalorder %v2545_v8, 17  ;;  %vm479_vm1 = vcmp.lt.s32.totalorder %v2545_v8, 15  ;;  %vm315_vm2 = vcmp.lt.s32.totalorder %v2545_v8, 16  ;;  %v2615_v62 = vld [vmem:[#allocation2 + $0x50] sm:$0xff] }
  0x1b   : > { %s2465_s20 = scalar_lea.vmem %s3150_s0, %s2186_s17  ;;  %s2364_s12 = smov 112   ;;  %v2617_v63 = vld [vmem:[#allocation2 + $0x40] sm:$0xff]  ;;  %vm578_vm5 = vcmp.lt.s32.totalorder %v2545_v8, 1  ;;  %vm754_vm6 = vcmp.lt.s32.totalorder %v2545_v8, 127  ;;  %vm853_vm7 = vcmp.lt.s32.totalorder %v2545_v8, 113  ;;  %vm952_vm8 = vcmp.lt.s32.totalorder %v2545_v8, 112 }
  0x1c   : > { %v2468_v0 = vld [vmem:[%s2465_s20 + $0x18] sm:$0xff]  ;;  %v2471_v1 = vld [vmem:[%s2465_s20 + $0x8] sm:$0xff]  ;;  %v2480_v2 = vld [vmem:[%s2465_s20 + $0x10] sm:$0xff]  ;;  %s2365_s13 = smov 111   ;;  %vm1051_vm9 = vcmp.lt.s32.totalorder %v2545_v8, 111  ;;  %s262_s16 = sand.u32 1, %s2345_s22  }
  0x1d   : > { %313 = vrot.lane.b32.xlu1 %v2468_v0, %s2358_s26  ;;  %309 = vrot.lane.b32.xlu0 %v2471_v1, %s2358_s26  ;;  %v2483_v3 = vld [vmem:[%s2465_s20] sm:$0xff]  ;;  %s2084_s17 = sshll.u32 %s262_s16, 5  ;;  %s2188_s18 = sshll.u32 %s2424_s25, 5 }
  0x1e   : > { %281 = vrot.lane.b32.xlu2 %v2471_v1, %s2359_s28  ;;  %s2000_s15 = scalar_lea.hbm %s3156_s6, %s2188_s18  ;;  %s264_s25 = scalar_lea.vmem [#allocation5], %s2084_s17 }
  0x1f   : > { %s2307_s17 = scalar_lea.hbm %s3156_s6, 64 }
  0x25   : > { %311 = vrot.lane.b32.xlu0 %v2480_v2, %s2358_s26  ;;  %307 = vrot.lane.b32.xlu1 %v2483_v3, %s2358_s26 }
  0x26   : > { %283 = vrot.lane.b32.xlu2 %v2480_v2, %s2359_s28 }
  0x2d   : > { %279 = vrot.lane.b32.xlu1 %v2483_v3, %s2359_s28  ;;  %285 = vrot.lane.b32.xlu0 %v2468_v0, %s2359_s28 }
  0x2e   : > { %473 = vrot.lane.b32.xlu2 %v2471_v1, %s2360_s29 }
  0x35   : > { %475 = vrot.lane.b32.xlu0 %v2480_v2, %s2360_s29  ;;  %477 = vrot.lane.b32.xlu1 %v2468_v0, %s2360_s29 }
  0x36   : > { %471 = vrot.lane.b32.xlu2 %v2483_v3, %s2360_s29 }
  0x3d   : > { %572 = vrot.lane.b32.xlu0 %v2471_v1, %s2361_s9  ;;  %574 = vrot.lane.b32.xlu1 %v2480_v2, %s2361_s9 }
  0x3e   : > { %576 = vrot.lane.b32.xlu2 %v2468_v0, %s2361_s9 }
  0x45   : > { %570 = vrot.lane.b32.xlu0 %v2483_v3, %s2361_s9  ;;  %746 = vrot.lane.b32.xlu1 %v2483_v3, %s2362_s10 }
  0x46   : > { %750 = vrot.lane.b32.xlu2 %v2480_v2, %s2362_s10 }
  0x4d   : > { %752 = vrot.lane.b32.xlu0 %v2468_v0, %s2362_s10  ;;  %748 = vrot.lane.b32.xlu1 %v2471_v1, %s2362_s10 }
  0x4e   : > { %845 = vrot.lane.b32.xlu2 %v2483_v3, %s2363_s11 }
  0x55   : > { %849 = vrot.lane.b32.xlu0 %v2480_v2, %s2363_s11  ;;  %851 = vrot.lane.b32.xlu1 %v2468_v0, %s2363_s11 }
  0x56   : > { %847 = vrot.lane.b32.xlu2 %v2471_v1, %s2363_s11 }
  0x5d   : > { %944 = vrot.lane.b32.xlu0 %v2483_v3, %s2364_s12  ;;  %948 = vrot.lane.b32.xlu1 %v2480_v2, %s2364_s12 }
  0x5e   : > { %950 = vrot.lane.b32.xlu2 %v2468_v0, %s2364_s12 }
  0x65   : > { %946 = vrot.lane.b32.xlu0 %v2471_v1, %s2364_s12  ;;  %1043 = vrot.lane.b32.xlu1 %v2483_v3, %s2365_s13 }
  0x66   : > { %1047 = vrot.lane.b32.xlu2 %v2480_v2, %s2365_s13 }
  0x6d   : > { %1049 = vrot.lane.b32.xlu0 %v2468_v0, %s2365_s13  ;;  %1045 = vrot.lane.b32.xlu1 %v2471_v1, %s2365_s13 }
  0x78   : > { %v282_v4 = vpop.permute.xlu2 %281 }
  0x80   : > { %v284_v5 = vpop.permute.xlu2 %283 }
  0x81   : > { %v291_v12 = vsel %vm289_vm0, %v282_v4, %v284_v5 }
  0x82   : > { %v300_v13 = vmul.f32 %v2548_v11, %v291_v12 }
  0x84   : > { %v305_v21 = vpack.c.bf16 %v300_v13, %v300_v13 }
  0x86   : > { %v414_v36 = vsel %vm339_vm3, %v305_v21, 0 }
  0x88   : > { %v2543_v7 = vpop.permute.xlu2 %473 }
  0x8f   : > { %v314_v9 = vpop.permute.xlu1 %313  ;;  %v310_v10 = vpop.permute.xlu0 %309 }
  0x90   : > { %v2554_v14 = vpop.permute.xlu2 %471 }
  0x91   : > { %v482_v22 = vsel %vm479_vm1, %v2554_v14, %v2543_v7 }
  0x92   : > { %v490_v37 = vmul.f32 %v2581_v31, %v482_v22 }
  0x94   : > { %v496_v51 = vpack.c.bf16 %v490_v37, %v490_v37 }
  0x96   : > { %v506_v58 = vsel %vm339_vm3, %v496_v51, 0 }
  0x97   : > { %v312_v19 = vpop.permute.xlu0 %311  ;;  %v308_v20 = vpop.permute.xlu1 %307 }
  0x98   : > { %v316_v23 = vsel %vm315_vm2, %v312_v19, %v314_v9  ;;  %v317_v24 = vsel %vm315_vm2, %v310_v10, %v312_v19  ;;  %v318_v25 = vsel %vm315_vm2, %v308_v20, %v310_v10  ;;  %v319_v26 = vsel %vm315_vm2, %v314_v9, %v308_v20 }
  0x99   : > { %v325_v27 = vmul.f32 %v2557_v15, %v319_v26  ;;  %v326_v28 = vmul.f32 %v2559_v16, %v318_v25  ;;  %v327_v29 = vmul.f32 %v2561_v17, %v317_v24  ;;  %v328_v30 = vmul.f32 %v2563_v18, %v316_v23  ;;  %v577_v26 = vpop.permute.xlu2 %576 }
  0x9b   : > { %v331_v32 = vpack.c.bf16 %v325_v27, %v325_v27  ;;  %v332_v33 = vpack.c.bf16 %v326_v28, %v326_v28  ;;  %v333_v34 = vpack.c.bf16 %v327_v29, %v327_v29  ;;  %v334_v35 = vpack.c.bf16 %v328_v30, %v328_v30  ;;  %v2639_v27 = vld [vmem:[#allocation2 + $0x70] sm:$0xff]  ;;  %v2641_v28 = vld [vmem:[#allocation2 + $0x78] sm:$0xff] }
  0x9d   : > { %v341_v38 = vsel %vm339_vm3, %v331_v32, 0  ;;  %v344_v39 = vsel %vm339_vm3, %v332_v33, 0  ;;  %v347_v40 = vsel %vm339_vm3, %v333_v34, 0  ;;  %v350_v41 = vsel %vm339_vm3, %v334_v35, 0 }
  0x9e   : > { %359 = vmatpush.bf16.msra.mxu0 %v341_v38  ;;  %372 = vmatpush.bf16.msra.mxu1 %v344_v39 }
  0x9f   : > { %385 = vmatpush.bf16.msra.mxu2 %v347_v40  ;;  %398 = vmatpush.bf16.msra.mxu3 %v350_v41  ;;  %v280_v46 = vpop.permute.xlu1 %279  ;;  %v286_v47 = vpop.permute.xlu0 %285  ;;  %v2655_v40 = vld [vmem:[#allocation2 + $0x68] sm:$0xff]  ;;  %v2657_v41 = vld [vmem:[#allocation2 + $0x60] sm:$0xff] }
  0xa0   : > { %v292_v48 = vsel %vm289_vm0, %v280_v46, %v282_v4  ;;  %v290_v49 = vsel %vm289_vm0, %v284_v5, %v286_v47  ;;  %v293_v50 = vsel %vm289_vm0, %v286_v47, %v280_v46  ;;  %v2619_v4 = vld [vmem:[#allocation2 + $0x58] sm:$0xff] }
  0xa1   : > { %v299_v52 = vmul.f32 %v2589_v42, %v292_v48  ;;  %2091 = vmatmul.msk.bf16.vlgmr.msra.gmra.mxu0 %vm335_vm4, %v2090_v43  ;;  %2092 = vmatmul.msk.bf16.vlgmr.msra.gmra.mxu1 %vm335_vm4, %v2090_v43  ;;  %v298_v53 = vmul.f32 %v2594_v44, %v293_v50  ;;  %v301_v54 = vmul.f32 %v2596_v45, %v290_v49 }
  0xa2   : > { %2093 = vmatmul.msk.bf16.vlgmr.msra.gmra.mxu2 %vm335_vm4, %v2090_v43  ;;  %2094 = vmatmul.msk.bf16.vlgmr.msra.gmra.mxu3 %vm335_vm4, %v2090_v43 }
  0xa3   : > { %452 = vmatpush.bf16.msrb.mxu2 %v414_v36  ;;  %v304_v55 = vpack.c.bf16 %v299_v52, %v299_v52  ;;  %v303_v56 = vpack.c.bf16 %v298_v53, %v298_v53  ;;  %v306_v57 = vpack.c.bf16 %v301_v54, %v301_v54  ;;  %v671_v53 = vpack.c.bf16 %v2483_v3, %v2483_v3 }
  0xa4   : > { %v672_v54 = vpack.c.bf16 %v2471_v1, %v2471_v1 }
  0xa5   : > { %v411_v59 = vsel %vm339_vm3, %v304_v55, 0  ;;  %v408_v60 = vsel %vm339_vm3, %v303_v56, 0  ;;  %v417_v61 = vsel %vm339_vm3, %v306_v57, 0  ;;  %v673_v57 = vpack.c.bf16 %v2480_v2, %v2480_v2 }
  0xa6   : > { %439 = vmatpush.bf16.msrb.mxu1 %v411_v59  ;;  %426 = vmatpush.bf16.msrb.mxu0 %v408_v60  ;;  %v2099_v59 = vld [vmem:[%s3152_s2 + $0x8] sm:$0xf]  ;;  %v679_v3 = vsel %vm339_vm3, %v671_v53, 0  ;;  %v682_v1 = vsel %vm339_vm3, %v672_v54, 0 }
  0xa7   : > { %465 = vmatpush.bf16.msrb.mxu3 %v417_v61  ;;  %v476_v5 = vpop.permute.xlu0 %475  ;;  %v478_v6 = vpop.permute.xlu1 %477  ;;  %v685_v60 = vsel %vm339_vm3, %v673_v57, 0 }
  0xa8   : > { %v481_v9 = vsel %vm479_vm1, %v2543_v7, %v476_v5  ;;  %v480_v10 = vsel %vm479_vm1, %v476_v5, %v478_v6  ;;  %v483_v12 = vsel %vm479_vm1, %v478_v6, %v2554_v14  ;;  %v302_v14 = vld [vmem:[%s3152_s2] sm:$0xf]  ;;  %v751_v61 = vpop.permute.xlu2 %750  ;;  %v2687_v6 = vld [vmem:[#allocation2 + $0xb8] sm:$0xff] }
  0xa9   : > { %v491_v13 = vmul.f32 %v2615_v62, %v481_v9  ;;  %v489_v19 = vmul.f32 %v2617_v63, %v483_v12  ;;  %v492_v20 = vmul.f32 %v2619_v4, %v480_v10  ;;  %v2691_v10 = vld [vmem:[#allocation2 + $0xa0] sm:$0xff] }
  0xaa   : > { %534 = vmatpush.bf16.msra.mxu1 %v506_v58  ;;  %v674_v58 = vpack.c.bf16 %v2468_v0, %v2468_v0 }
  0xab   : > { %v497_v21 = vpack.c.bf16 %v491_v13, %v491_v13  ;;  %v495_v22 = vpack.c.bf16 %v489_v19, %v489_v19  ;;  %v498_v23 = vpack.c.bf16 %v492_v20, %v492_v20  ;;  %v2695_v13 = vld [vmem:[#allocation2 + $0xb0] sm:$0xff]  ;;  %v2699_v20 = vld [vmem:[#allocation2 + $0xa8] sm:$0xff] }
  0xac   : > { %v688_v2 = vsel %vm339_vm3, %v674_v58, 0 }
  0xad   : > { %v509_v24 = vsel %vm339_vm3, %v497_v21, 0  ;;  %v503_v7 = vsel %vm339_vm3, %v495_v22, 0  ;;  %v512_v25 = vsel %vm339_vm3, %v498_v23, 0 }
  0xae   : > { %547 = vmatpush.bf16.msra.mxu2 %v509_v24  ;;  %521 = vmatpush.bf16.msra.mxu0 %v503_v7 }
  0xaf   : > { %v573_v29 = vpop.permute.xlu0 %572  ;;  %560 = vmatpush.bf16.msra.mxu3 %v512_v25  ;;  %v575_v30 = vpop.permute.xlu1 %574 }
  0xb0   : > { %v580_v32 = vsel %vm578_vm5, %v573_v29, %v575_v30  ;;  %v579_v33 = vsel %vm578_vm5, %v575_v30, %v577_v26  ;;  %v846_v25 = vpop.permute.xlu2 %845 }
  0xb1   : > { %2095 = vmatmul.msk.bf16.vlgmr.msrb.gmra.mxu0 %vm335_vm4, %v302_v14  ;;  %2096 = vmatmul.msk.bf16.vlgmr.msrb.gmra.mxu1 %vm335_vm4, %v302_v14  ;;  %v590_v34 = vmul.f32 %v2639_v27, %v580_v32  ;;  %v591_v35 = vmul.f32 %v2641_v28, %v579_v33  ;;  %v2104_v32 = vld [vmem:[%s3152_s2 + $0xc] sm:$0xf] }
  0xb2   : > { %2097 = vmatmul.msk.bf16.vlgmr.msrb.gmra.mxu2 %vm335_vm4, %v302_v14  ;;  %2098 = vmatmul.msk.bf16.vlgmr.msrb.gmra.mxu3 %vm335_vm4, %v302_v14 }
  0xb3   : > { %v596_v36 = vpack.c.bf16 %v590_v34, %v590_v34  ;;  %v597_v37 = vpack.c.bf16 %v591_v35, %v591_v35 }
  0xb5   : > { %v608_v38 = vsel %vm339_vm3, %v596_v36, 0  ;;  %v611_v39 = vsel %vm339_vm3, %v597_v37, 0 }
  0xb6   : > { %646 = vmatpush.bf16.msrb.mxu2 %v608_v38  ;;  %659 = vmatpush.bf16.msrb.mxu3 %v611_v39 }
  0xb7   : > { %v571_v43 = vpop.permute.xlu0 %570  ;;  %v747_v50 = vpop.permute.xlu1 %746 }
  0xb8   : > { %v581_v46 = vsel %vm578_vm5, %v571_v43, %v573_v29  ;;  %v582_v47 = vsel %vm578_vm5, %v577_v26, %v571_v43  ;;  %v848_v38 = vpop.permute.xlu2 %847  ;;  %v2719_v43 = vld [vmem:[#allocation2 + $0xc0] sm:$0xff] }
  0xb9   : > { %v589_v48 = vmul.f32 %v2655_v40, %v581_v46  ;;  %v588_v49 = vmul.f32 %v2657_v41, %v582_v47  ;;  %v856_v46 = vsel %vm853_vm7, %v846_v25, %v848_v38  ;;  %v2723_v47 = vld [vmem:[#allocation2 + $0xd8] sm:$0xff] }
  0xba   : > { %v863_v53 = vmul.f32 %v2719_v43, %v856_v46 }
  0xbb   : > { %v595_v51 = vpack.c.bf16 %v589_v48, %v589_v48  ;;  %v594_v52 = vpack.c.bf16 %v588_v49, %v588_v49  ;;  %v2727_v49 = vld [vmem:[#allocation2 + $0xc8] sm:$0xff] }
  0xbc   : > { %v869_v58 = vpack.c.bf16 %v863_v53, %v863_v53 }
  0xbd   : > { %v605_v55 = vsel %vm339_vm3, %v595_v51, 0  ;;  %v602_v56 = vsel %vm339_vm3, %v594_v52, 0  ;;  %v2731_v51 = vld [vmem:[#allocation2 + $0xd0] sm:$0xff] }
  0xbe   : > { %633 = vmatpush.bf16.msrb.mxu1 %v605_v55  ;;  %620 = vmatpush.bf16.msrb.mxu0 %v602_v56 }
  0xbf   : > { %v753_v0 = vpop.permute.xlu0 %752  ;;  %v749_v5 = vpop.permute.xlu1 %748 }
  0xc0   : > { %v758_v9 = vsel %vm754_vm6, %v753_v0, %v747_v50  ;;  %v757_v12 = vsel %vm754_vm6, %v747_v50, %v749_v5  ;;  %v755_v19 = vsel %vm754_vm6, %v751_v61, %v753_v0  ;;  %v756_v21 = vsel %vm754_vm6, %v749_v5, %v751_v61 }
  0xc1   : > { %2100 = vmatmul.msk.bf16.vlgmr.msra.gmra.mxu0 %vm335_vm4, %v2099_v59  ;;  %2101 = vmatmul.msk.bf16.vlgmr.msra.gmra.mxu1 %vm335_vm4, %v2099_v59  ;;  %v767_v22 = vmul.f32 %v2687_v6, %v758_v9  ;;  %v764_v23 = vmul.f32 %v2691_v10, %v757_v12  ;;  %v766_v24 = vmul.f32 %v2695_v13, %v755_v19  ;;  %v951_v12 = vpop.permute.xlu2 %950 }
  0xc2   : > { %2102 = vmatmul.msk.bf16.vlgmr.msra.gmra.mxu2 %vm335_vm4, %v2099_v59  ;;  %2103 = vmatmul.msk.bf16.vlgmr.msra.gmra.mxu3 %vm335_vm4, %v2099_v59  ;;  %v765_v7 = vmul.f32 %v2699_v20, %v756_v21  ;;  %v2751_v21 = vld [vmem:[#allocation2 + $0xe0] sm:$0xff] }
  0xc3   : > { %697 = vmatpush.bf16.msra.mxu0 %v679_v3  ;;  %710 = vmatpush.bf16.msra.mxu1 %v682_v1  ;;  %v773_v26 = vpack.c.bf16 %v767_v22, %v767_v22  ;;  %v770_v14 = vpack.c.bf16 %v764_v23, %v764_v23  ;;  %v772_v29 = vpack.c.bf16 %v766_v24, %v766_v24  ;;  %v2755_v23 = vld [vmem:[#allocation2 + $0xf8] sm:$0xff] }
  0xc4   : > { %723 = vmatpush.bf16.msra.mxu2 %v685_v60  ;;  %736 = vmatpush.bf16.msra.mxu3 %v688_v2  ;;  %v771_v30 = vpack.c.bf16 %v765_v7, %v765_v7  ;;  %v2109_v60 = vld [vmem:[%s3152_s2 + $0x10] sm:$0xf]  ;;  %v877_v2 = vsel %vm339_vm3, %v869_v58, 0  ;;  %3167 = vst [vmem:[#allocation8_spill] sm:$0xff] %v2751_v21  ;;  %v2759_v7 = vld [vmem:[#allocation2 + $0xe8] sm:$0xff]  ;;  %v2787_v58 = vld [vmem:[#allocation2 + $0x100] sm:$0xff] }
  0xc5   : > { %v778_v33 = vsel %vm339_vm3, %v770_v14, 0  ;;  %v787_v34 = vsel %vm339_vm3, %v773_v26, 0  ;;  %v784_v36 = vsel %vm339_vm3, %v772_v29, 0  ;;  %3168 = vst [vmem:[#allocation9_spill] sm:$0xff] %v2755_v23 }
  0xc6   : > { %v781_v35 = vsel %vm339_vm3, %v771_v30, 0  ;;  %3169 = vst [vmem:[#allocation10_spill] sm:$0xff] %v2759_v7 }
  0xc7   : > { %v850_v37 = vpop.permute.xlu0 %849  ;;  %v852_v39 = vpop.permute.xlu1 %851  ;;  %3172 = vst [vmem:[#allocation13_spill] sm:$0xff] %v2787_v58 }
  0xc8   : > { %v857_v48 = vsel %vm853_vm7, %v852_v39, %v846_v25  ;;  %v855_v50 = vsel %vm853_vm7, %v848_v38, %v850_v37  ;;  %v854_v52 = vsel %vm853_vm7, %v850_v37, %v852_v39  ;;  %v2761_v25 = vld [vmem:[#allocation2 + $0xf0] sm:$0xff] }
  0xc9   : > { %v866_v54 = vmul.f32 %v2723_v47, %v857_v48  ;;  %v864_v55 = vmul.f32 %v2727_v49, %v855_v50  ;;  %v865_v56 = vmul.f32 %v2731_v51, %v854_v52  ;;  %3170 = vst [vmem:[#allocation11_spill] sm:$0xff] %v2761_v25  ;;  %v2114_v39 = vld [vmem:[%s3152_s2 + $0x14] sm:$0xf] }
  0xcb   : > { %v872_v59 = vpack.c.bf16 %v866_v54, %v866_v54  ;;  %v870_v3 = vpack.c.bf16 %v864_v55, %v864_v55  ;;  %v871_v1 = vpack.c.bf16 %v865_v56, %v865_v56  ;;  %v1048_v55 = vpop.permute.xlu2 %1047  ;;  %v2783_v56 = vld [vmem:[#allocation2 + $0x118] sm:$0xff] }
  0xcc   : > { %3171 = vst [vmem:[#allocation12_spill] sm:$0xff] %v2783_v56 }
  0xcd   : > { %v886_v0 = vsel %vm339_vm3, %v872_v59, 0  ;;  %v880_v61 = vsel %vm339_vm3, %v870_v3, 0  ;;  %v883_v5 = vsel %vm339_vm3, %v871_v1, 0  ;;  %v2791_v3 = vld [vmem:[#allocation2 + $0x108] sm:$0xff]  ;;  %v2793_v1 = vld [vmem:[#allocation2 + $0x110] sm:$0xff] }
  0xce   : > { %3173 = vst [vmem:[#allocation14_spill] sm:$0xff] %v2791_v3 }
  0xcf   : > { %v945_v57 = vpop.permute.xlu0 %944  ;;  %v949_v19 = vpop.permute.xlu1 %948  ;;  %3174 = vst [vmem:[#allocation15_spill] sm:$0xff] %v2793_v1 }
  0xd0   : > { %v956_v24 = vsel %vm952_vm8, %v951_v12, %v945_v57  ;;  %v953_v26 = vsel %vm952_vm8, %v949_v19, %v951_v12 }
  0xd1   : > { %2105 = vmatmul.msk.bf16.vlgmr.msrb.gmra.mxu0 %vm335_vm4, %v2104_v32  ;;  %2106 = vmatmul.msk.bf16.vlgmr.msrb.gmra.mxu1 %vm335_vm4, %v2104_v32  ;;  %v965_v30 = vmul.f32 %v2755_v23, %v956_v24 }
  0xd2   : > { %2107 = vmatmul.msk.bf16.vlgmr.msrb.gmra.mxu2 %vm335_vm4, %v2104_v32  ;;  %2108 = vmatmul.msk.bf16.vlgmr.msrb.gmra.mxu3 %vm335_vm4, %v2104_v32 }
  0xd3   : > { %796 = vmatpush.bf16.msrb.mxu0 %v778_v33  ;;  %835 = vmatpush.bf16.msrb.mxu3 %v787_v34  ;;  %v964_v33 = vmul.f32 %v2761_v25, %v953_v26  ;;  %v2119_v26 = vld [vmem:[%s3152_s2 + $0x18] sm:$0xf] }
  0xd4   : > { %809 = vmatpush.bf16.msrb.mxu1 %v781_v35  ;;  %822 = vmatpush.bf16.msrb.mxu2 %v784_v36  ;;  %v971_v36 = vpack.c.bf16 %v965_v30, %v965_v30 }
  0xd5   : > { %v970_v38 = vpack.c.bf16 %v964_v33, %v964_v33  ;;  %v2124_v33 = vld [vmem:[%s3152_s2 + $0x1c] sm:$0xf] }
  0xd6   : > { %v985_v48 = vsel %vm339_vm3, %v971_v36, 0  ;;  %v2129_v36 = vld [vmem:[%s3152_s2 + $0x20] sm:$0xf] }
  0xd7   : > { %v947_v9 = vpop.permute.xlu0 %946  ;;  %v1044_v34 = vpop.permute.xlu1 %1043  ;;  %v982_v52 = vsel %vm339_vm3, %v970_v38, 0 }
  0xd8   : > { %v955_v22 = vsel %vm952_vm8, %v945_v57, %v947_v9  ;;  %v954_v14 = vsel %vm952_vm8, %v947_v9, %v949_v19 }
  0xd9   : > { %v962_v29 = vmul.f32 %v2751_v21, %v955_v22  ;;  %v963_v32 = vmul.f32 %v2759_v7, %v954_v14 }
  0xdb   : > { %v968_v35 = vpack.c.bf16 %v962_v29, %v962_v29  ;;  %v969_v37 = vpack.c.bf16 %v963_v32, %v963_v32 }
  0xdd   : > { %v976_v46 = vsel %vm339_vm3, %v968_v35, 0  ;;  %v979_v50 = vsel %vm339_vm3, %v969_v37, 0 }
  0xdf   : > { %v1050_v53 = vpop.permute.xlu0 %1049  ;;  %v1046_v54 = vpop.permute.xlu1 %1045 }
  0xe0   : > { %v1055_v57 = vsel %vm1051_vm9, %v1050_v53, %v1044_v34  ;;  %v1054_v59 = vsel %vm1051_vm9, %v1044_v34, %v1046_v54 }
  0xe1   : > { %2110 = vmatmul.msk.bf16.vlgmr.msra.gmra.mxu0 %vm335_vm4, %v2109_v60  ;;  %2111 = vmatmul.msk.bf16.vlgmr.msra.gmra.mxu1 %vm335_vm4, %v2109_v60 }
  0xe2   : > { %2112 = vmatmul.msk.bf16.vlgmr.msra.gmra.mxu2 %vm335_vm4, %v2109_v60  ;;  %2113 = vmatmul.msk.bf16.vlgmr.msra.gmra.mxu3 %vm335_vm4, %v2109_v60  ;;  %v1052_v60 = vsel %vm1051_vm9, %v1048_v55, %v1050_v53 }
  0xe3   : > { %895 = vmatpush.bf16.msra.mxu0 %v877_v2  ;;  %934 = vmatpush.bf16.msra.mxu3 %v886_v0  ;;  %v1053_v2 = vsel %vm1051_vm9, %v1046_v54, %v1048_v55  ;;  %v1064_v0 = vmul.f32 %v2783_v56, %v1055_v57  ;;  %v1063_v9 = vmul.f32 %v2793_v1, %v1052_v60 }
  0xe4   : > { %908 = vmatpush.bf16.msra.mxu1 %v880_v61  ;;  %921 = vmatpush.bf16.msra.mxu2 %v883_v5  ;;  %v1061_v61 = vmul.f32 %v2787_v58, %v1054_v59  ;;  %v1062_v5 = vmul.f32 %v2791_v3, %v1053_v2 }
  0xe5   : > { %v1070_v12 = vpack.c.bf16 %v1064_v0, %v1064_v0  ;;  %v1069_v24 = vpack.c.bf16 %v1063_v9, %v1063_v9 }
  0xe6   : > { %v1067_v19 = vpack.c.bf16 %v1061_v61, %v1061_v61  ;;  %v1068_v22 = vpack.c.bf16 %v1062_v5, %v1062_v5 }
  0xe7   : > { %v1084_v29 = vsel %vm339_vm3, %v1070_v12, 0  ;;  %v1081_v32 = vsel %vm339_vm3, %v1069_v24, 0 }
  0xe8   : > { %v1075_v14 = vsel %vm339_vm3, %v1067_v19, 0  ;;  %v1078_v30 = vsel %vm339_vm3, %v1068_v22, 0 }
  0xf1   : > { %2115 = vmatmul.msk.bf16.vlgmr.msrb.gmra.mxu0 %vm335_vm4, %v2114_v39  ;;  %2116 = vmatmul.msk.bf16.vlgmr.msrb.gmra.mxu1 %vm335_vm4, %v2114_v39 }
  0xf2   : > { %2117 = vmatmul.msk.bf16.vlgmr.msrb.gmra.mxu2 %vm335_vm4, %v2114_v39  ;;  %2118 = vmatmul.msk.bf16.vlgmr.msrb.gmra.mxu3 %vm335_vm4, %v2114_v39 }
  0xf3   : > { %994 = vmatpush.bf16.msrb.mxu0 %v976_v46  ;;  %1033 = vmatpush.bf16.msrb.mxu3 %v985_v48  ;;  %v2366_v48 = vmov 0  }
  0xf4   : > { %1007 = vmatpush.bf16.msrb.mxu1 %v979_v50  ;;  %1020 = vmatpush.bf16.msrb.mxu2 %v982_v52  ;;  %v1142_v50 = vld [vmem:[%s3153_s3] sm:$0xff] }
  0xf5   : > { %2251 = vset.pattern.permute.xlu2 %v2366_v48  ;;  %2252 = vset.pattern.permute.xlu0 %v2366_v48 }
  0xf6   : > { %1145 = vperm.xlu2 %2251, %v1142_v50  }
 0x101   : > { %2120 = vmatmul.msk.bf16.vlgmr.msra.gmra.mxu0 %vm335_vm4, %v2119_v26  ;;  %2121 = vmatmul.msk.bf16.vlgmr.msra.gmra.mxu1 %vm335_vm4, %v2119_v26 }
 0x102   : > { %2122 = vmatmul.msk.bf16.vlgmr.msra.gmra.mxu2 %vm335_vm4, %v2119_v26  ;;  %2123 = vmatmul.msk.bf16.vlgmr.msra.gmra.mxu3 %vm335_vm4, %v2119_v26 }
 0x103   : > { %1093 = vmatpush.bf16.msra.mxu0 %v1075_v14  ;;  %1132 = vmatpush.bf16.msra.mxu3 %v1084_v29 }
 0x104   : > { %1106 = vmatpush.bf16.msra.mxu1 %v1078_v30  ;;  %1119 = vmatpush.bf16.msra.mxu2 %v1081_v32 }
 0x111   : > { %2125 = vmatmul.msk.bf16.vlgmr.msrb.gmra.mxu0 %vm335_vm4, %v2124_v33  ;;  %2126 = vmatmul.msk.bf16.vlgmr.msrb.gmra.mxu1 %vm335_vm4, %v2124_v33 }
 0x112   : > { %2127 = vmatmul.msk.bf16.vlgmr.msrb.gmra.mxu2 %vm335_vm4, %v2124_v33  ;;  %2128 = vmatmul.msk.bf16.vlgmr.msrb.gmra.mxu3 %vm335_vm4, %v2124_v33 }
 0x11e   : > { %v361_v34 = vpop.f32.mrf.mxu0  ;;  %v374_v35 = vpop.f32.mrf.mxu1 }
 0x121   : > { %2130 = vmatmul.msk.bf16.vlgmr.msra.gmra.mxu0 %vm335_vm4, %v2129_v36  ;;  %2131 = vmatmul.msk.bf16.vlgmr.msra.gmra.mxu1 %vm335_vm4, %v2129_v36 }
 0x122   : > { %2132 = vmatmul.msk.bf16.vlgmr.msra.gmra.mxu2 %vm335_vm4, %v2129_v36  ;;  %2133 = vmatmul.msk.bf16.vlgmr.msra.gmra.mxu3 %vm335_vm4, %v2129_v36 }
 0x125   : > { %v387_v37 = vpop.f32.mrf.mxu2  ;;  %v400_v38 = vpop.f32.mrf.mxu3 }
 0x126   : > { %v363_v39 = vpop.f32.mrf.mxu0  ;;  %v376_v46 = vpop.f32.mrf.mxu1 }
 0x12d   : > { %v389_v52 = vpop.f32.mrf.mxu2  ;;  %v402_v53 = vpop.f32.mrf.mxu3 }
 0x12e   : > { %v428_v54 = vpop.f32.mrf.mxu0  ;;  %v441_v55 = vpop.f32.mrf.mxu1 }
 0x12f   : > { %v429_v57 = vadd.f32 %v428_v54, %v361_v34  ;;  %v442_v59 = vadd.f32 %v441_v55, %v374_v35 }
 0x135   : > { %v454_v60 = vpop.f32.mrf.mxu2  ;;  %v467_v2 = vpop.f32.mrf.mxu3 }
 0x136   : > { %v455_v0 = vadd.f32 %v454_v60, %v387_v37  ;;  %v468_v61 = vadd.f32 %v467_v2, %v400_v38  ;;  %v430_v5 = vpop.f32.mrf.mxu0  ;;  %v443_v9 = vpop.f32.mrf.mxu1 }
 0x13d   : > { %v456_v12 = vpop.f32.mrf.mxu2  ;;  %v469_v19 = vpop.f32.mrf.mxu3 }
 0x13e   : > { %v523_v22 = vpop.f32.mrf.mxu0  ;;  %v536_v24 = vpop.f32.mrf.mxu1 }
 0x13f   : > { %v566_v26 = vadd.f32 %v523_v22, %v429_v57  ;;  %v567_v14 = vadd.f32 %v536_v24, %v442_v59 }
 0x145   : > { %v549_v29 = vpop.f32.mrf.mxu2  ;;  %v562_v30 = vpop.f32.mrf.mxu3 }
 0x146   : > { %v568_v32 = vadd.f32 %v549_v29, %v455_v0  ;;  %v569_v33 = vadd.f32 %v562_v30, %v468_v61  ;;  %v525_v36 = vpop.f32.mrf.mxu0  ;;  %v538_v39 = vpop.f32.mrf.mxu1 }
 0x14d   : > { %v551_v34 = vpop.f32.mrf.mxu2  ;;  %v564_v35 = vpop.f32.mrf.mxu3 }
 0x14e   : > { %v622_v46 = vpop.f32.mrf.mxu0  ;;  %v635_v48 = vpop.f32.mrf.mxu1 }
 0x14f   : > { %v665_v37 = vadd.f32 %v622_v46, %v566_v26  ;;  %v666_v38 = vadd.f32 %v635_v48, %v567_v14 }
 0x155   : > { %v648_v50 = vpop.f32.mrf.mxu2  ;;  %v661_v52 = vpop.f32.mrf.mxu3 }
 0x156   : > { %v667_v53 = vadd.f32 %v648_v50, %v568_v32  ;;  %v668_v54 = vadd.f32 %v661_v52, %v569_v33  ;;  %v624_v55 = vpop.f32.mrf.mxu0  ;;  %v637_v60 = vpop.f32.mrf.mxu1 }
 0x15d   : > { %v650_v57 = vpop.f32.mrf.mxu2  ;;  %v663_v59 = vpop.f32.mrf.mxu3 }
 0x15e   : > { %v699_v2 = vpop.f32.mrf.mxu0  ;;  %v712_v5 = vpop.f32.mrf.mxu1 }
 0x15f   : > { %v742_v0 = vadd.f32 %v699_v2, %v665_v37 }
 0x165   : > { %v725_v61 = vpop.f32.mrf.mxu2  ;;  %v738_v9 = vpop.f32.mrf.mxu3 }
 0x166   : > { %v701_v12 = vpop.f32.mrf.mxu0  ;;  %v714_v19 = vpop.f32.mrf.mxu1  ;;  %v744_v56 = vadd.f32 %v725_v61, %v667_v53  ;;  %v745_v1 = vadd.f32 %v738_v9, %v668_v54 }
 0x16d   : > { %v727_v22 = vpop.f32.mrf.mxu2  ;;  %v740_v24 = vpop.f32.mrf.mxu3 }
 0x16e   : > { %v798_v29 = vpop.f32.mrf.mxu0  ;;  %v811_v26 = vpop.f32.mrf.mxu1  ;;  %v743_v22 = vadd.f32 %v712_v5, %v666_v38 }
 0x170   : > { %v842_v24 = vadd.f32 %v811_v26, %v743_v22 }
 0x175   : > { %v824_v14 = vpop.f32.mrf.mxu2  ;;  %v837_v30 = vpop.f32.mrf.mxu3 }
 0x176   : > { %v800_v36 = vpop.f32.mrf.mxu0  ;;  %v813_v32 = vpop.f32.mrf.mxu1  ;;  %v843_v7 = vadd.f32 %v824_v14, %v744_v56  ;;  %v844_v21 = vadd.f32 %v837_v30, %v745_v1  ;;  %v1968_v30 = vld [vmem:[%s3155_s5] sm:$0xff] }
 0x177   : > { %v1146_v32 = vpop.permute.xlu2 %1145 }
 0x17d   : > { %v826_v33 = vpop.f32.mrf.mxu2  ;;  %v839_v39 = vpop.f32.mrf.mxu3 }
 0x17e   : > { %v897_v34 = vpop.f32.mrf.mxu0  ;;  %v910_v35 = vpop.f32.mrf.mxu1  ;;  %v841_v33 = vadd.f32 %v798_v29, %v742_v0 }
 0x17f   : > { %v941_v36 = vadd.f32 %v910_v35, %v842_v24 }
 0x185   : > { %v923_v46 = vpop.f32.mrf.mxu2  ;;  %v936_v48 = vpop.f32.mrf.mxu3 }
 0x186   : > { %v899_v50 = vpop.f32.mrf.mxu0  ;;  %v912_v37 = vpop.f32.mrf.mxu1 }
 0x18d   : > { %v925_v52 = vpop.f32.mrf.mxu2  ;;  %v938_v55 = vpop.f32.mrf.mxu3 }
 0x18e   : > { %v996_v60 = vpop.f32.mrf.mxu0  ;;  %v1009_v57 = vpop.f32.mrf.mxu1  ;;  %v940_v52 = vadd.f32 %v897_v34, %v841_v33 }
 0x18f   : > { %v1040_v39 = vadd.f32 %v1009_v57, %v941_v36 }
 0x190   : > { %v1039_v25 = vadd.f32 %v996_v60, %v940_v52 }
 0x195   : > { %v1022_v59 = vpop.f32.mrf.mxu2  ;;  %v1035_v2 = vpop.f32.mrf.mxu3 }
 0x196   : > { %v998_v12 = vpop.f32.mrf.mxu0  ;;  %v1011_v19 = vpop.f32.mrf.mxu1 }
 0x197   : > { %v942_v12 = vadd.f32 %v923_v46, %v843_v7  ;;  %v943_v19 = vadd.f32 %v936_v48, %v844_v21 }
 0x199   : > { %v1041_v26 = vadd.f32 %v1022_v59, %v942_v12  ;;  %v1042_v0 = vadd.f32 %v1035_v2, %v943_v19  ;;  %v2134_v19 = vld [vmem:[%s3154_s4 + $0x4] sm:$0xf] }
 0x19d   : > { %v1024_v3 = vpop.f32.mrf.mxu2  ;;  %v1037_v58 = vpop.f32.mrf.mxu3 }
 0x19e   : > { %v1095_v50 = vpop.f32.mrf.mxu0  ;;  %v1108_v37 = vpop.f32.mrf.mxu1 }
 0x19f   : > { %v1139_v55 = vadd.f32 %v1108_v37, %v1040_v39  ;;  %v1138_v38 = vadd.f32 %v1095_v50, %v1039_v25 }
 0x1a1   : > { %v1149_v23 = vadd.f32 %v1146_v32, %v1139_v55  ;;  %v1148_v56 = vadd.f32 %v1146_v32, %v1138_v38 }
 0x1a3   : > { %v2831_v5 = vmax.f32 %v1149_v23, 0.0  ;;  %v2839_v23 = vmax.f32 %v1148_v56, 0.0 }
 0x1a5   : > { %v1121_v29 = vpop.f32.mrf.mxu2  ;;  %v1134_v3 = vpop.f32.mrf.mxu3  ;;  %1179 = vrot.lane.b32.xlu0 %v2831_v5, %s2358_s26 }
 0x1a6   : > { %v1140_v58 = vadd.f32 %v1121_v29, %v1041_v26  ;;  %v1141_v53 = vadd.f32 %v1134_v3, %v1042_v0  ;;  %v1110_v54 = vpop.f32.mrf.mxu1  ;;  %v1097_v61 = vpop.f32.mrf.mxu0 }
 0x1a8   : > { %v1150_v1 = vadd.f32 %v1146_v32, %v1140_v58  ;;  %v1151_v9 = vadd.f32 %v1146_v32, %v1141_v53 }
 0x1aa   : > { %v2835_v14 = vmax.f32 %v1150_v1, 0.0  ;;  %v2837_v21 = vmax.f32 %v1151_v9, 0.0 }
 0x1ac   : > { %1181 = vrot.lane.b32.xlu1 %v2835_v14, %s2358_s26  ;;  %1183 = vrot.lane.b32.xlu2 %v2837_v21, %s2358_s26 }
 0x1ad   : > { %v1123_v7 = vpop.f32.mrf.mxu2  ;;  %1177 = vrot.lane.b32.xlu0 %v2839_v23, %s2358_s26  ;;  %v1136_v25 = vpop.f32.mrf.mxu3 }
 0x1b4   : > { %1160 = vrot.lane.b32.xlu2 %v2835_v14, %s2359_s28  ;;  %1158 = vrot.lane.b32.xlu1 %v2831_v5, %s2359_s28 }
 0x1b5   : > { %1162 = vrot.lane.b32.xlu0 %v2837_v21, %s2359_s28 }
 0x1bc   : > { %1335 = vrot.lane.b32.xlu2 %v2831_v5, %s2360_s29  ;;  %1156 = vrot.lane.b32.xlu1 %v2839_v23, %s2359_s28  ;;  %s2001_s28 = sshll.u32 %s264_s25, 4  ;;  %s2002_s28 = int_to_ptr.vmem [resolvable:$true] %s2001_s28 }
 0x1bd   : > { %1337 = vrot.lane.b32.xlu0 %v2835_v14, %s2360_s29 }
 0x1c4   : > { %1333 = vrot.lane.b32.xlu2 %v2839_v23, %s2360_s29  ;;  %1339 = vrot.lane.b32.xlu1 %v2837_v21, %s2360_s29  ;;  %s2003_s29 = sshll.u32 %s2000_s15, 4  ;;  %s2004_s29 = int_to_ptr.hbm [resolvable:$true] %s2003_s29 }
 0x1c5   : > { %1428 = vrot.lane.b32.xlu0 %v2831_v5, %s2361_s9 }
 0x1cc   : > { %1432 = vrot.lane.b32.xlu2 %v2837_v21, %s2361_s9  ;;  %1430 = vrot.lane.b32.xlu1 %v2835_v14, %s2361_s9 }
 0x1cd   : > { %1426 = vrot.lane.b32.xlu0 %v2839_v23, %s2361_s9  ;;  %s1988_s9 = scalar_lea.sflag [#allocation4], %s262_s16 }
 0x1d4   : > { %1600 = vrot.lane.b32.xlu2 %v2835_v14, %s2362_s10  ;;  %1596 = vrot.lane.b32.xlu1 %v2839_v23, %s2362_s10 }
 0x1d5   : > { %1602 = vrot.lane.b32.xlu0 %v2837_v21, %s2362_s10 }
 0x1dc   : > { %1689 = vrot.lane.b32.xlu2 %v2839_v23, %s2363_s11  ;;  %1598 = vrot.lane.b32.xlu1 %v2831_v5, %s2362_s10  ;;  %s2301_s10 = sshra.s32 %s2004_s29, 4  ;;  %s2302_s10 = int_to_ptr.hbm [resolvable:$true] %s2301_s10 }
 0x1dd   : > { %1693 = vrot.lane.b32.xlu0 %v2835_v14, %s2363_s11  ;;  %p2308_p3 = scmp.lt.s32.totalorder %s2302_s10, %s3156_s6 }
 0x1e4   : > { %1691 = vrot.lane.b32.xlu2 %v2831_v5, %s2363_s11  ;;  %1695 = vrot.lane.b32.xlu1 %v2837_v21, %s2363_s11  ;;  %s2303_s11 = scalar_lea.hbm %s2302_s10, 32 }
 0x1e5   : > { %1782 = vrot.lane.b32.xlu0 %v2839_v23, %s2364_s12  ;;  %p2304_p0 = scmp.ne.s32.totalorder %s2302_s10, %s2303_s11  ;;  %p2309_p4 = scmp.lt.s32.totalorder %s2307_s17, %s2303_s11 }
 0x1e7   : > { %p2305_p1 = pnand %p2304_p0, %p2441_p5  ;;  %p2310_p7 = por %p2309_p4, %p2308_p3 }
 0x1e9   : > { %p2306_p2 = pneg %p2305_p1 }
 0x1eb   : > { %p2311_p8 = pnand %p2310_p7, %p2306_p2 }
 0x1ec   : > { %1788 = vrot.lane.b32.xlu2 %v2837_v21, %s2364_s12  ;;  %1786 = vrot.lane.b32.xlu1 %v2835_v14, %s2364_s12 }
 0x1ed   : > { %1784 = vrot.lane.b32.xlu0 %v2831_v5, %s2364_s12 }
 0x1f4   : > { %1879 = vrot.lane.b32.xlu2 %v2835_v14, %s2365_s13  ;;  %1875 = vrot.lane.b32.xlu1 %v2839_v23, %s2365_s13 }
 0x1f5   : > { %1881 = vrot.lane.b32.xlu0 %v2837_v21, %s2365_s13 }
 0x1fc   : > { %1971 = vperm.xlu2 %2251, %v1968_v30   ;;  %1877 = vrot.lane.b32.xlu1 %v2831_v5, %s2365_s13 }
 0x206   : > { %v1184_v34 = vpop.permute.xlu2 %1183 }
 0x20e   : > { %v1161_v35 = vpop.permute.xlu2 %1160 }
 0x216   : > { %v1336_v48 = vpop.permute.xlu2 %1335 }
 0x217   : > { %v1180_v46 = vpop.permute.xlu0 %1179 }
 0x21e   : > { %v1182_v60 = vpop.permute.xlu1 %1181  ;;  %v1334_v26 = vpop.permute.xlu2 %1333 }
 0x21f   : > { %v1185_v57 = vsel %vm315_vm2, %v1182_v60, %v1184_v34  ;;  %v1186_v59 = vsel %vm315_vm2, %v1180_v46, %v1182_v60  ;;  %v1178_v2 = vpop.permute.xlu0 %1177  ;;  %v1343_v53 = vsel %vm479_vm1, %v1334_v26, %v1336_v48 }
 0x220   : > { %v1191_v22 = vmul.f32 %v1186_v59, %v2561_v17  ;;  %v1192_v24 = vmul.f32 %v1185_v57, %v2563_v18  ;;  %v1187_v36 = vsel %vm315_vm2, %v1178_v2, %v1180_v46  ;;  %v1188_v32 = vsel %vm315_vm2, %v1184_v34, %v1178_v2 }
 0x221   : > { %v1190_v33 = vmul.f32 %v1187_v36, %v2559_v16  ;;  %v1189_v37 = vmul.f32 %v1188_v32, %v2557_v15  ;;  %v1346_v56 = vmul.f32 %v1343_v53, %v2581_v31  ;;  %v1523_v53 = vpack.c.bf16 %v2835_v14, %v2835_v14 }
 0x222   : > { %v1197_v39 = vpack.c.bf16 %v1191_v22, %v1191_v22  ;;  %v1198_v50 = vpack.c.bf16 %v1192_v24, %v1192_v24  ;;  %v1521_v14 = vpack.c.bf16 %v2839_v23, %v2839_v23 }
 0x223   : > { %v1196_v52 = vpack.c.bf16 %v1190_v33, %v1190_v33  ;;  %v1195_v55 = vpack.c.bf16 %v1189_v37, %v1189_v37  ;;  %v1352_v31 = vpack.c.bf16 %v1346_v56, %v1346_v56 }
 0x224   : > { %v1209_v12 = vsel %vm339_vm3, %v1197_v39, 0  ;;  %v1212_v17 = vsel %vm339_vm3, %v1198_v50, 0  ;;  %v1529_v23 = vsel %vm339_vm3, %v1521_v14, 0 }
 0x225   : > { %1247 = vmatpush.bf16.msrb.mxu2 %v1209_v12  ;;  %1260 = vmatpush.bf16.msrb.mxu3 %v1212_v17  ;;  %v1206_v18 = vsel %vm339_vm3, %v1196_v52, 0  ;;  %v1203_v16 = vsel %vm339_vm3, %v1195_v55, 0  ;;  %v1362_v24 = vsel %vm339_vm3, %v1352_v31, 0 }
 0x226   : > { %v1159_v38 = vpop.permute.xlu1 %1158  ;;  %1234 = vmatpush.bf16.msrb.mxu1 %v1206_v18  ;;  %1221 = vmatpush.bf16.msrb.mxu0 %v1203_v16  ;;  %v1433_v12 = vpop.permute.xlu2 %1432 }
 0x227   : > { %v1165_v15 = vsel %vm289_vm0, %v1159_v38, %v1161_v35  ;;  %v1163_v0 = vpop.permute.xlu0 %1162 }
 0x228   : > { %v1170_v29 = vmul.f32 %v1165_v15, %v2548_v11  ;;  %2137 = vmatmul.msk.bf16.vlgmr.msrb.gmra.mxu2 %vm335_vm4, %v2134_v19  ;;  %2138 = vmatmul.msk.bf16.vlgmr.msrb.gmra.mxu3 %vm335_vm4, %v2134_v19  ;;  %v1164_v3 = vsel %vm289_vm0, %v1161_v35, %v1163_v0 }
 0x229   : > { %v1171_v58 = vmul.f32 %v1164_v3, %v2596_v45  ;;  %2136 = vmatmul.msk.bf16.vlgmr.msrb.gmra.mxu1 %vm335_vm4, %v2134_v19  ;;  %2135 = vmatmul.msk.bf16.vlgmr.msrb.gmra.mxu0 %vm335_vm4, %v2134_v19 }
 0x22a   : > { %v1175_v54 = vpack.c.bf16 %v1170_v29, %v1170_v29 }
 0x22b   : > { %v1176_v61 = vpack.c.bf16 %v1171_v58, %v1171_v58 }
 0x22c   : > { %v1276_v11 = vsel %vm339_vm3, %v1175_v54, 0 }
 0x22d   : > { %1314 = vmatpush.bf16.msra.mxu2 %v1276_v11  ;;  %v1279_v1 = vsel %vm339_vm3, %v1176_v61, 0  ;;  %v1524_v61 = vpack.c.bf16 %v2837_v21, %v2837_v21 }
 0x22e   : > { %v1157_v9 = vpop.permute.xlu1 %1156  ;;  %1327 = vmatpush.bf16.msra.mxu3 %v1279_v1  ;;  %v1522_v1 = vpack.c.bf16 %v2831_v5, %v2831_v5  ;;  %v1601_v21 = vpop.permute.xlu2 %1600 }
 0x22f   : > { %v1166_v45 = vsel %vm289_vm0, %v1157_v9, %v1159_v38  ;;  %v1167_v7 = vsel %vm289_vm0, %v1163_v0, %v1157_v9  ;;  %v1338_v25 = vpop.permute.xlu0 %1337  ;;  %v1535_v9 = vsel %vm339_vm3, %v1523_v53, 0 }
 0x230   : > { %v1168_v30 = vmul.f32 %v1167_v7, %v2594_v44  ;;  %v1169_v34 = vmul.f32 %v1166_v45, %v2589_v42  ;;  %v1342_v35 = vsel %vm479_vm1, %v1336_v48, %v1338_v25  ;;  %v1172_v42 = vld [vmem:[%s3154_s4] sm:$0xf]  ;;  %v1538_v45 = vsel %vm339_vm3, %v1524_v61, 0 }
 0x231   : > { %v1347_v46 = vmul.f32 %v1342_v35, %v2615_v62  ;;  %v1532_v5 = vsel %vm339_vm3, %v1522_v1, 0 }
 0x232   : > { %v1173_v60 = vpack.c.bf16 %v1168_v30, %v1168_v30  ;;  %v1174_v57 = vpack.c.bf16 %v1169_v34, %v1169_v34 }
 0x233   : > { %v1353_v59 = vpack.c.bf16 %v1347_v46, %v1347_v46 }
 0x234   : > { %v1270_v2 = vsel %vm339_vm3, %v1173_v60, 0  ;;  %v1273_v22 = vsel %vm339_vm3, %v1174_v57, 0 }
 0x235   : > { %1288 = vmatpush.bf16.msra.mxu0 %v1270_v2  ;;  %1301 = vmatpush.bf16.msra.mxu1 %v1273_v22  ;;  %v1365_v44 = vsel %vm339_vm3, %v1353_v59, 0 }
 0x236   : > { %v1340_v48 = vpop.permute.xlu1 %1339  ;;  %1403 = vmatpush.bf16.msrb.mxu2 %v1365_v44  ;;  %v1690_v57 = vpop.permute.xlu2 %1689  ;;  %v2148_v44 = vld [vmem:[%s3154_s4 + $0xc] sm:$0xf] }
 0x237   : > { %v1341_v62 = vsel %vm479_vm1, %v1338_v25, %v1340_v48  ;;  %v1344_v36 = vsel %vm479_vm1, %v1340_v48, %v1334_v26  ;;  %v1429_v32 = vpop.permute.xlu0 %1428 }
 0x238   : > { %v1345_v33 = vmul.f32 %v1344_v36, %v2617_v63  ;;  %v1348_v39 = vmul.f32 %v1341_v62, %v2619_v4  ;;  %2141 = vmatmul.msk.bf16.vlgmr.msra.gmra.mxu2 %vm335_vm4, %v1172_v42  ;;  %2142 = vmatmul.msk.bf16.vlgmr.msra.gmra.mxu3 %vm335_vm4, %v1172_v42 }
 0x239   : > { %1390 = vmatpush.bf16.msrb.mxu1 %v1362_v24  ;;  %2139 = vmatmul.msk.bf16.vlgmr.msra.gmra.mxu0 %vm335_vm4, %v1172_v42 }
 0x23a   : > { %2140 = vmatmul.msk.bf16.vlgmr.msra.gmra.mxu1 %vm335_vm4, %v1172_v42  ;;  %v1351_v50 = vpack.c.bf16 %v1345_v33, %v1345_v33  ;;  %v1354_v37 = vpack.c.bf16 %v1348_v39, %v1348_v39 }
 0x23c   : > { %v1359_v52 = vsel %vm339_vm3, %v1351_v50, 0  ;;  %v1368_v55 = vsel %vm339_vm3, %v1354_v37, 0 }
 0x23d   : > { %1377 = vmatpush.bf16.msrb.mxu0 %v1359_v52  ;;  %1416 = vmatpush.bf16.msrb.mxu3 %v1368_v55 }
 0x23e   : > { %v1431_v63 = vpop.permute.xlu1 %1430 }
 0x23f   : > { %v1434_v4 = vsel %vm578_vm5, %v1431_v63, %v1433_v12  ;;  %v1435_v17 = vsel %vm578_vm5, %v1429_v32, %v1431_v63  ;;  %v1427_v18 = vpop.permute.xlu0 %1426 }
 0x240   : > { %v1440_v19 = vmul.f32 %v1435_v17, %v2639_v27  ;;  %v1441_v38 = vmul.f32 %v1434_v4, %v2641_v28  ;;  %v1436_v16 = vsel %vm578_vm5, %v1427_v18, %v1429_v32  ;;  %v1437_v26 = vsel %vm578_vm5, %v1433_v12, %v1427_v18  ;;  %v1692_v32 = vpop.permute.xlu2 %1691 }
 0x241   : > { %v1439_v15 = vmul.f32 %v1436_v16, %v2655_v40  ;;  %v1438_v3 = vmul.f32 %v1437_v26, %v2657_v41  ;;  %v2143_v41 = vld [vmem:[%s3154_s4 + $0x8] sm:$0xf]  ;;  %v1699_v50 = vsel %vm853_vm7, %v1690_v57, %v1692_v32 }
 0x242   : > { %v1446_v0 = vpack.c.bf16 %v1440_v19, %v1440_v19  ;;  %v1447_v29 = vpack.c.bf16 %v1441_v38, %v1441_v38  ;;  %v1701_v12 = vmul.f32 %v1699_v50, %v2719_v43  ;;  %v2153_v19 = vld [vmem:[%s3154_s4 + $0x10] sm:$0xf] }
 0x243   : > { %v1445_v58 = vpack.c.bf16 %v1439_v15, %v1439_v15  ;;  %v1444_v54 = vpack.c.bf16 %v1438_v3, %v1438_v3 }
 0x244   : > { %v1458_v27 = vsel %vm339_vm3, %v1446_v0, 0  ;;  %v1461_v28 = vsel %vm339_vm3, %v1447_v29, 0  ;;  %v1707_v38 = vpack.c.bf16 %v1701_v12, %v1701_v12 }
 0x245   : > { %1496 = vmatpush.bf16.msra.mxu2 %v1458_v27  ;;  %1509 = vmatpush.bf16.msra.mxu3 %v1461_v28  ;;  %v1455_v40 = vsel %vm339_vm3, %v1445_v58, 0  ;;  %v1452_v56 = vsel %vm339_vm3, %v1444_v54, 0  ;;  %v3175_v54 = vld [vmem:[#allocation9_spill] sm:$0xff]  ;;  %v3176_v28 = vld [vmem:[#allocation11_spill] sm:$0xff] }
 0x246   : > { %v1597_v11 = vpop.permute.xlu1 %1596  ;;  %1483 = vmatpush.bf16.msra.mxu1 %v1455_v40  ;;  %1470 = vmatpush.bf16.msra.mxu0 %v1452_v56  ;;  %v3177_v40 = vld [vmem:[#allocation8_spill] sm:$0xff] }
 0x247   : > { %v1603_v7 = vpop.permute.xlu0 %1602 }
 0x248   : > { %2146 = vmatmul.msk.bf16.vlgmr.msrb.gmra.mxu2 %vm335_vm4, %v2143_v41  ;;  %2147 = vmatmul.msk.bf16.vlgmr.msrb.gmra.mxu3 %vm335_vm4, %v2143_v41  ;;  %v1604_v25 = vsel %vm754_vm6, %v1601_v21, %v1603_v7  ;;  %v1607_v30 = vsel %vm754_vm6, %v1603_v7, %v1597_v11  ;;  %v1789_v15 = vpop.permute.xlu2 %1788 }
 0x249   : > { %1573 = vmatpush.bf16.msrb.mxu2 %v1535_v9  ;;  %1586 = vmatpush.bf16.msrb.mxu3 %v1538_v45  ;;  %v1610_v46 = vmul.f32 %v1604_v25, %v2695_v13  ;;  %v1611_v60 = vmul.f32 %v1607_v30, %v2687_v6  ;;  %v2158_v9 = vld [vmem:[%s3154_s4 + $0x14] sm:$0xf] }
 0x24a   : > { %2144 = vmatmul.msk.bf16.vlgmr.msrb.gmra.mxu0 %vm335_vm4, %v2143_v41  ;;  %2145 = vmatmul.msk.bf16.vlgmr.msrb.gmra.mxu1 %vm335_vm4, %v2143_v41 }
 0x24b   : > { %1547 = vmatpush.bf16.msrb.mxu0 %v1529_v23  ;;  %1560 = vmatpush.bf16.msrb.mxu1 %v1532_v5  ;;  %v1616_v22 = vpack.c.bf16 %v1610_v46, %v1610_v46  ;;  %v1617_v24 = vpack.c.bf16 %v1611_v60, %v1611_v60 }
 0x24d   : > { %v1628_v6 = vsel %vm339_vm3, %v1616_v22, 0  ;;  %v1631_v13 = vsel %vm339_vm3, %v1617_v24, 0  ;;  %v3180_v24 = vld [vmem:[#allocation12_spill] sm:$0xff] }
 0x24e   : > { %v1599_v34 = vpop.permute.xlu1 %1598 }
 0x24f   : > { %v1605_v35 = vsel %vm754_vm6, %v1599_v34, %v1601_v21  ;;  %v1606_v31 = vsel %vm754_vm6, %v1597_v11, %v1599_v34  ;;  %v1694_v62 = vpop.permute.xlu0 %1693  ;;  %v3178_v11 = vld [vmem:[#allocation10_spill] sm:$0xff] }
 0x250   : > { %v1608_v59 = vmul.f32 %v1606_v31, %v2691_v10  ;;  %v1609_v2 = vmul.f32 %v1605_v35, %v2699_v20  ;;  %v1698_v37 = vsel %vm853_vm7, %v1692_v32, %v1694_v62  ;;  %v1880_v35 = vpop.permute.xlu2 %1879 }
 0x251   : > { %v1702_v63 = vmul.f32 %v1698_v37, %v2727_v49  ;;  %v1715_v49 = vsel %vm339_vm3, %v1707_v38, 0  ;;  %v2168_v37 = vld [vmem:[%s3154_s4 + $0x1c] sm:$0xf] }
 0x252   : > { %v1614_v42 = vpack.c.bf16 %v1608_v59, %v1608_v59  ;;  %v1615_v48 = vpack.c.bf16 %v1609_v2, %v1609_v2  ;;  %v3179_v2 = vld [vmem:[#allocation15_spill] sm:$0xff] }
 0x253   : > { %v1708_v16 = vpack.c.bf16 %v1702_v63, %v1702_v63 }
 0x254   : > { %v1622_v20 = vsel %vm339_vm3, %v1614_v42, 0  ;;  %v1625_v36 = vsel %vm339_vm3, %v1615_v48, 0  ;;  %v3181_v42 = vld [vmem:[#allocation13_spill] sm:$0xff] }
 0x256   : > { %v1696_v10 = vpop.permute.xlu1 %1695 }
 0x257   : > { %v1697_v33 = vsel %vm853_vm7, %v1694_v62, %v1696_v10  ;;  %v1700_v39 = vsel %vm853_vm7, %v1696_v10, %v1690_v57  ;;  %v1783_v4 = vpop.permute.xlu0 %1782  ;;  %v3182_v62 = vld [vmem:[#allocation14_spill] sm:$0xff] }
 0x258   : > { %2151 = vmatmul.msk.bf16.vlgmr.msra.gmra.mxu2 %vm335_vm4, %v2148_v44  ;;  %2152 = vmatmul.msk.bf16.vlgmr.msra.gmra.mxu3 %vm335_vm4, %v2148_v44  ;;  %v1703_v52 = vmul.f32 %v1697_v33, %v2731_v51  ;;  %v1704_v55 = vmul.f32 %v1700_v39, %v2723_v47  ;;  %v1718_v51 = vsel %vm339_vm3, %v1708_v16, 0  ;;  %v1793_v29 = vsel %vm952_vm8, %v1789_v15, %v1783_v4 }
 0x259   : > { %1666 = vmatpush.bf16.msra.mxu2 %v1628_v6  ;;  %1679 = vmatpush.bf16.msra.mxu3 %v1631_v13  ;;  %v1797_v27 = vmul.f32 %v1793_v29, %v3175_v54 }
 0x25a   : > { %2149 = vmatmul.msk.bf16.vlgmr.msra.gmra.mxu0 %vm335_vm4, %v2148_v44  ;;  %2150 = vmatmul.msk.bf16.vlgmr.msra.gmra.mxu1 %vm335_vm4, %v2148_v44  ;;  %v1709_v17 = vpack.c.bf16 %v1703_v52, %v1703_v52  ;;  %v1710_v18 = vpack.c.bf16 %v1704_v55, %v1704_v55  ;;  %v2173_v52 = vld [vmem:[%s3154_s4 + $0x20] sm:$0xf] }
 0x25b   : > { %1640 = vmatpush.bf16.msra.mxu0 %v1622_v20  ;;  %1653 = vmatpush.bf16.msra.mxu1 %v1625_v36  ;;  %v1803_v1 = vpack.c.bf16 %v1797_v27, %v1797_v27  ;;  %v2163_v20 = vld [vmem:[%s3154_s4 + $0x18] sm:$0xf] }
 0x25c   : > { %v1721_v47 = vsel %vm339_vm3, %v1709_v17, 0  ;;  %v1724_v43 = vsel %vm339_vm3, %v1710_v18, 0 }
 0x25d   : > { %v1817_v5 = vsel %vm339_vm3, %v1803_v1, 0 }
 0x25e   : > { %v1787_v26 = vpop.permute.xlu1 %1786 }
 0x25f   : > { %v1785_v0 = vpop.permute.xlu0 %1784  ;;  %v1790_v3 = vsel %vm952_vm8, %v1787_v26, %v1789_v15 }
 0x260   : > { %v1791_v58 = vsel %vm952_vm8, %v1785_v0, %v1787_v26  ;;  %v1792_v53 = vsel %vm952_vm8, %v1783_v4, %v1785_v0  ;;  %v1796_v61 = vmul.f32 %v1790_v3, %v3176_v28 }
 0x261   : > { %v1794_v41 = vmul.f32 %v1792_v53, %v3177_v40  ;;  %v1795_v56 = vmul.f32 %v1791_v58, %v3178_v11 }
 0x262   : > { %v1802_v21 = vpack.c.bf16 %v1796_v61, %v1796_v61 }
 0x263   : > { %v1800_v45 = vpack.c.bf16 %v1794_v41, %v1794_v41  ;;  %v1801_v7 = vpack.c.bf16 %v1795_v56, %v1795_v56 }
 0x264   : > { %v1814_v23 = vsel %vm339_vm3, %v1802_v21, 0 }
 0x265   : > { %v1808_v30 = vsel %vm339_vm3, %v1800_v45, 0  ;;  %v1811_v34 = vsel %vm339_vm3, %v1801_v7, 0 }
 0x266   : > { %v1876_v14 = vpop.permute.xlu1 %1875 }
 0x267   : > { %v1882_v25 = vpop.permute.xlu0 %1881 }
 0x268   : > { %2156 = vmatmul.msk.bf16.vlgmr.msrb.gmra.mxu2 %vm335_vm4, %v2153_v19  ;;  %2157 = vmatmul.msk.bf16.vlgmr.msrb.gmra.mxu3 %vm335_vm4, %v2153_v19  ;;  %v1883_v46 = vsel %vm1051_vm9, %v1880_v35, %v1882_v25  ;;  %v1886_v60 = vsel %vm1051_vm9, %v1882_v25, %v1876_v14 }
 0x269   : > { %1759 = vmatpush.bf16.msrb.mxu2 %v1721_v47  ;;  %1772 = vmatpush.bf16.msrb.mxu3 %v1724_v43  ;;  %v1889_v22 = vmul.f32 %v1883_v46, %v3179_v2  ;;  %v1890_v44 = vmul.f32 %v1886_v60, %v3180_v24 }
 0x26a   : > { %2154 = vmatmul.msk.bf16.vlgmr.msrb.gmra.mxu0 %vm335_vm4, %v2153_v19  ;;  %2155 = vmatmul.msk.bf16.vlgmr.msrb.gmra.mxu1 %vm335_vm4, %v2153_v19 }
 0x26b   : > { %1733 = vmatpush.bf16.msrb.mxu0 %v1715_v49  ;;  %1746 = vmatpush.bf16.msrb.mxu1 %v1718_v51  ;;  %v1895_v13 = vpack.c.bf16 %v1889_v22, %v1889_v22  ;;  %v1896_v10 = vpack.c.bf16 %v1890_v44, %v1890_v44 }
 0x26d   : > { %v1907_v8 = vsel %vm339_vm3, %v1895_v13, 0  ;;  %v1910_v33 = vsel %vm339_vm3, %v1896_v10, 0 }
 0x26e   : > { %v1878_v31 = vpop.permute.xlu1 %1877 }
 0x26f   : > { %v1884_v57 = vsel %vm1051_vm9, %v1878_v31, %v1880_v35  ;;  %v1885_v59 = vsel %vm1051_vm9, %v1876_v14, %v1878_v31 }
 0x270   : > { %v1887_v48 = vmul.f32 %v1885_v59, %v3181_v42  ;;  %v1888_v6 = vmul.f32 %v1884_v57, %v3182_v62 }
 0x272   : > { %v1893_v36 = vpack.c.bf16 %v1887_v48, %v1887_v48  ;;  %v1894_v32 = vpack.c.bf16 %v1888_v6, %v1888_v6 }
 0x274   : > { %v1901_v39 = vsel %vm339_vm3, %v1893_v36, 0  ;;  %v1904_v50 = vsel %vm339_vm3, %v1894_v32, 0 }
 0x278   : > { %2161 = vmatmul.msk.bf16.vlgmr.msra.gmra.mxu2 %vm335_vm4, %v2158_v9  ;;  %2162 = vmatmul.msk.bf16.vlgmr.msra.gmra.mxu3 %vm335_vm4, %v2158_v9 }
 0x279   : > { %1852 = vmatpush.bf16.msra.mxu2 %v1814_v23  ;;  %1865 = vmatpush.bf16.msra.mxu3 %v1817_v5 }
 0x27a   : > { %2159 = vmatmul.msk.bf16.vlgmr.msra.gmra.mxu0 %vm335_vm4, %v2158_v9  ;;  %2160 = vmatmul.msk.bf16.vlgmr.msra.gmra.mxu1 %vm335_vm4, %v2158_v9 }
 0x27b   : > { %1826 = vmatpush.bf16.msra.mxu0 %v1808_v30  ;;  %1839 = vmatpush.bf16.msra.mxu1 %v1811_v34 }
 0x288   : > { %2166 = vmatmul.msk.bf16.vlgmr.msrb.gmra.mxu2 %vm335_vm4, %v2163_v20  ;;  %2167 = vmatmul.msk.bf16.vlgmr.msrb.gmra.mxu3 %vm335_vm4, %v2163_v20 }
 0x289   : > { %1945 = vmatpush.bf16.msrb.mxu2 %v1907_v8  ;;  %1958 = vmatpush.bf16.msrb.mxu3 %v1910_v33 }
 0x28a   : > { %2164 = vmatmul.msk.bf16.vlgmr.msrb.gmra.mxu0 %vm335_vm4, %v2163_v20  ;;  %2165 = vmatmul.msk.bf16.vlgmr.msrb.gmra.mxu1 %vm335_vm4, %v2163_v20 }
 0x28b   : > { %1919 = vmatpush.bf16.msrb.mxu0 %v1901_v39  ;;  %1932 = vmatpush.bf16.msrb.mxu1 %v1904_v50 }
 0x298   : > { %2171 = vmatmul.msk.bf16.vlgmr.msra.gmra.mxu2 %vm335_vm4, %v2168_v37  ;;  %2172 = vmatmul.msk.bf16.vlgmr.msra.gmra.mxu3 %vm335_vm4, %v2168_v37 }
 0x29a   : > { %2169 = vmatmul.msk.bf16.vlgmr.msra.gmra.mxu0 %vm335_vm4, %v2168_v37  ;;  %2170 = vmatmul.msk.bf16.vlgmr.msra.gmra.mxu1 %vm335_vm4, %v2168_v37 }
 0x2a6   : > { %v1236_v55 = vpop.f32.mrf.mxu1  ;;  %v1223_v12 = vpop.f32.mrf.mxu0 }
 0x2a8   : > { %2176 = vmatmul.msk.bf16.vlgmr.msrb.gmra.mxu2 %vm335_vm4, %v2173_v52  ;;  %2177 = vmatmul.msk.bf16.vlgmr.msrb.gmra.mxu3 %vm335_vm4, %v2173_v52 }
 0x2aa   : > { %2174 = vmatmul.msk.bf16.vlgmr.msrb.gmra.mxu0 %vm335_vm4, %v2173_v52  ;;  %2175 = vmatmul.msk.bf16.vlgmr.msrb.gmra.mxu1 %vm335_vm4, %v2173_v52 }
 0x2ab   : > { %v1249_v63 = vpop.f32.mrf.mxu2  ;;  %v1262_v4 = vpop.f32.mrf.mxu3 }
 0x2ae   : > { %v1238_v17 = vpop.f32.mrf.mxu1  ;;  %v1225_v18 = vpop.f32.mrf.mxu0 }
 0x2b3   : > { %v1251_v19 = vpop.f32.mrf.mxu2  ;;  %v1264_v38 = vpop.f32.mrf.mxu3 }
 0x2b6   : > { %v1290_v26 = vpop.f32.mrf.mxu0 }
 0x2b7   : > { %v1303_v16 = vpop.f32.mrf.mxu1  ;;  %v1291_v43 = vadd.f32 %v1290_v26, %v1223_v12 }
 0x2b8   : > { %v1304_v47 = vadd.f32 %v1303_v16, %v1236_v55 }
 0x2bb   : > { %v1316_v49 = vpop.f32.mrf.mxu2  ;;  %v1329_v51 = vpop.f32.mrf.mxu3 }
 0x2bc   : > { %v1317_v15 = vadd.f32 %v1316_v49, %v1249_v63  ;;  %v1330_v0 = vadd.f32 %v1329_v51, %v1262_v4 }
 0x2be   : > { %v1292_v3 = vpop.f32.mrf.mxu0 }
 0x2bf   : > { %v1305_v29 = vpop.f32.mrf.mxu1 }
 0x2c3   : > { %v1318_v58 = vpop.f32.mrf.mxu2  ;;  %v1331_v53 = vpop.f32.mrf.mxu3 }
 0x2c7   : > { %v1379_v54 = vpop.f32.mrf.mxu0  ;;  %v1392_v27 = vpop.f32.mrf.mxu1 }
 0x2c8   : > { %v1422_v28 = vadd.f32 %v1379_v54, %v1291_v43  ;;  %v1423_v61 = vadd.f32 %v1392_v27, %v1304_v47 }
 0x2cb   : > { %v1405_v40 = vpop.f32.mrf.mxu2  ;;  %v1418_v41 = vpop.f32.mrf.mxu3 }
 0x2cc   : > { %v1424_v11 = vadd.f32 %v1405_v40, %v1317_v15  ;;  %v1425_v56 = vadd.f32 %v1418_v41, %v1330_v0 }
 0x2cf   : > { %v1381_v14 = vpop.f32.mrf.mxu0  ;;  %v1394_v1 = vpop.f32.mrf.mxu1 }
 0x2d3   : > { %v1407_v21 = vpop.f32.mrf.mxu2  ;;  %v1420_v9 = vpop.f32.mrf.mxu3 }
 0x2d4   : > { %v1972_v21 = vpop.permute.xlu2 %1971 }
 0x2d7   : > { %v1472_v45 = vpop.f32.mrf.mxu0  ;;  %v1485_v7 = vpop.f32.mrf.mxu1 }
 0x2d8   : > { %v1515_v23 = vadd.f32 %v1472_v45, %v1422_v28  ;;  %v1516_v5 = vadd.f32 %v1485_v7, %v1423_v61 }
 0x2db   : > { %v1498_v25 = vpop.f32.mrf.mxu2  ;;  %v1511_v30 = vpop.f32.mrf.mxu3 }
 0x2dc   : > { %v1517_v34 = vadd.f32 %v1498_v25, %v1424_v11  ;;  %v1518_v35 = vadd.f32 %v1511_v30, %v1425_v56  ;;  %v2253_v30 = vld [vmem:[%s2465_s20] sm:$0xff] }
 0x2df   : > { %v1474_v31 = vpop.f32.mrf.mxu0  ;;  %v1487_v46 = vpop.f32.mrf.mxu1 }
 0x2e3   : > { %v1500_v60 = vpop.f32.mrf.mxu2  ;;  %v1513_v57 = vpop.f32.mrf.mxu3 }
 0x2e7   : > { %v1549_v59 = vpop.f32.mrf.mxu0  ;;  %v1562_v2 = vpop.f32.mrf.mxu1 }
 0x2e8   : > { %v1592_v47 = vadd.f32 %v1549_v59, %v1515_v23  ;;  %v1593_v43 = vadd.f32 %v1562_v2, %v1516_v5 }
 0x2eb   : > { %v1575_v22 = vpop.f32.mrf.mxu2  ;;  %v1588_v24 = vpop.f32.mrf.mxu3 }
 0x2ec   : > { %v1594_v29 = vadd.f32 %v1575_v22, %v1517_v34  ;;  %v1595_v3 = vadd.f32 %v1588_v24, %v1518_v35  ;;  %v2254_v35 = vld [vmem:[%s2465_s20 + $0x8] sm:$0xff]  ;;  %v2255_v24 = vld [vmem:[%s2465_s20 + $0x10] sm:$0xff] }
 0x2ef   : > { %v1551_v44 = vpop.f32.mrf.mxu0  ;;  %v1564_v42 = vpop.f32.mrf.mxu1 }
 0x2f0   : > { %v2256_v42 = vld [vmem:[%s2465_s20 + $0x18] sm:$0xff] }
 0x2f3   : > { %v1577_v48 = vpop.f32.mrf.mxu2  ;;  %v1590_v62 = vpop.f32.mrf.mxu3 }
 0x2f7   : > { %v1642_v6 = vpop.f32.mrf.mxu0  ;;  %v1655_v13 = vpop.f32.mrf.mxu1 }
 0x2f8   : > { %v1685_v49 = vadd.f32 %v1642_v6, %v1592_v47  ;;  %v1686_v51 = vadd.f32 %v1655_v13, %v1593_v43 }
 0x2fb   : > { %v1668_v10 = vpop.f32.mrf.mxu2  ;;  %v1681_v20 = vpop.f32.mrf.mxu3 }
 0x2fc   : > { %v1687_v54 = vadd.f32 %v1668_v10, %v1594_v29  ;;  %v1688_v27 = vadd.f32 %v1681_v20, %v1595_v3 }
 0x2ff   : > { %v1644_v36 = vpop.f32.mrf.mxu0  ;;  %v1657_v32 = vpop.f32.mrf.mxu1 }
 0x303   : > { %v1670_v8 = vpop.f32.mrf.mxu2  ;;  %v1683_v33 = vpop.f32.mrf.mxu3 }
 0x307   : > { %v1735_v39 = vpop.f32.mrf.mxu0  ;;  %v1748_v50 = vpop.f32.mrf.mxu1 }
 0x308   : > { %v1778_v58 = vadd.f32 %v1735_v39, %v1685_v49  ;;  %v1779_v53 = vadd.f32 %v1748_v50, %v1686_v51 }
 0x30b   : > { %v1761_v37 = vpop.f32.mrf.mxu2  ;;  %v1774_v52 = vpop.f32.mrf.mxu3 }
 0x30c   : > { %v1780_v11 = vadd.f32 %v1761_v37, %v1687_v54  ;;  %v1781_v56 = vadd.f32 %v1774_v52, %v1688_v27 }
 0x30f   : > { %v1737_v55 = vpop.f32.mrf.mxu0  ;;  %v1750_v12 = vpop.f32.mrf.mxu1 }
 0x313   : > { %v1763_v63 = vpop.f32.mrf.mxu2  ;;  %v1776_v4 = vpop.f32.mrf.mxu3 }
 0x317   : > { %v1828_v17 = vpop.f32.mrf.mxu0  ;;  %v1841_v18 = vpop.f32.mrf.mxu1 }
 0x318   : > { %v1871_v28 = vadd.f32 %v1828_v17, %v1778_v58  ;;  %v1872_v61 = vadd.f32 %v1841_v18, %v1779_v53 }
 0x31b   : > { %v1854_v19 = vpop.f32.mrf.mxu2  ;;  %v1867_v38 = vpop.f32.mrf.mxu3 }
 0x31c   : > { %v1873_v9 = vadd.f32 %v1854_v19, %v1780_v11  ;;  %v1874_v45 = vadd.f32 %v1867_v38, %v1781_v56 }
 0x31f   : > { %v1830_v16 = vpop.f32.mrf.mxu0  ;;  %v1843_v26 = vpop.f32.mrf.mxu1 }
 0x323   : > { %v1856_v15 = vpop.f32.mrf.mxu2  ;;  %v1869_v0 = vpop.f32.mrf.mxu3 }
 0x327   : > { %v1921_v40 = vpop.f32.mrf.mxu0  ;;  %v1934_v41 = vpop.f32.mrf.mxu1 }
 0x328   : > { %v1964_v14 = vadd.f32 %v1921_v40, %v1871_v28  ;;  %v1965_v1 = vadd.f32 %v1934_v41, %v1872_v61 }
 0x32a   : > { %v1974_v7 = vadd.f32 %v1972_v21, %v1964_v14  ;;  %v1975_v23 = vadd.f32 %v1972_v21, %v1965_v1 }
 0x32b   : > { %v1947_v5 = vpop.f32.mrf.mxu2  ;;  %v1960_v25 = vpop.f32.mrf.mxu3 }
 0x32c   : > { %v1978_v34 = vadd.f32 %v2253_v30, %v1974_v7  ;;  %v1979_v31 = vadd.f32 %v2254_v35, %v1975_v23  ;;  %v1966_v46 = vadd.f32 %v1947_v5, %v1873_v9  ;;  %v1967_v60 = vadd.f32 %v1960_v25, %v1874_v45 }
 0x32e   : > { %1982 = vst [vmem:[%s264_s25] sm:$0xff] %v1978_v34  ;;  %v1976_v57 = vadd.f32 %v1972_v21, %v1966_v46  ;;  %v1977_v59 = vadd.f32 %v1972_v21, %v1967_v60 }
 0x32f   : > { %1983 = vst [vmem:[%s264_s25 + $0x8] sm:$0xff] %v1979_v31  ;;  %v1923_v2 = vpop.f32.mrf.mxu0  ;;  %v1936_v22 = vpop.f32.mrf.mxu1 }
 0x330   : > { %v1980_v44 = vadd.f32 %v2255_v24, %v1976_v57  ;;  %v1981_v48 = vadd.f32 %v2256_v42, %v1977_v59 }
 0x332   : > { %2178 = vst [vmem:[%s264_s25 + $0x10] sm:$0xff] %v1980_v44 }
 0x333   : > { %2179 = vst [vmem:[%s264_s25 + $0x18] sm:$0xff] %v1981_v48  ;;  %v1949_v62 = vpop.f32.mrf.mxu2  ;;  %v1962_v6 = vpop.f32.mrf.mxu3 }
 0x334   : > { %2314 = shalt.err (!%p2311_p8)
}
 0x335   : > { %s2367_s16 = smov 256  }
 0x336   : > { %2193 = dma.vmem_to_hbm [thread:$0]  (%p2441_p5), %s2002_s28, 512, %s2004_s29, %s1988_s9, %s2367_s16, %s2367_s16, %s2358_s26  }
 0x337 PF: > { %p2205_p9 = scmp.ge.s32.totalorder %s2353_s24, 2  ;;  %s2018_s19 = sand.u32 1, %s2341_s21  }
 0x338   : > { %s2019_s14 = scalar_lea.sflag [#allocation4], %s2018_s19 }
 0x339   : > { %p2200_p10 = pnand %p2205_p9, %p2445_p6 }
 0x33b   : > { %p2201_p11 = pneg %p2200_p10 }
 0x33d   : > { %2336 = dma.done.wait (%p2201_p11), %s2019_s14, 512  }
 0x33e   : > { %2338 = vsyncadd (%p2201_p11), %s2019_s14, 4294966784  ;;  %p17_p12 = scmp.ge.s32.totalorder %s2428_s27, 4   ;;  %s3183_s21 = smov %s2345_s22 }
 0x33f   : > { %s3184_s22 = smov %s2349_s23  ;;  %s3185_s23 = smov %s2439_s30 }
 0x340   : > { %s3186_s24 = smov %s2428_s27  ;;  %19 = sbr.rel (!%p17_p12) target bundleno = 4 (0x4), region = 109 }
 0x345   :  { %2025 = vsyncpa [#allocation3], 1 }
 0x346   :  { %2027 = vsyncpa [#allocation3 + $0x1], 1 }
 0x347   :  { %2028 = vsyncpa [#allocation4], 1 }
 0x348   :  { %2030 = vsyncpa [#allocation4 + $0x1], 1 }

</bundles_post_ra>
